<compile_context>
chip_gen: v7x
topology: tpu7x:2x2x1
jax: 0.10.0
libtpu: 0.0.40
codegen_flags: <defaults>
</compile_context>

<pallas_src>
import functools

import jax
import jax.numpy as jnp
from jax.experimental import pallas as pl
from jax.experimental.pallas import tpu as pltpu

IMG_FEATURES = 512        # 'VGG' feature type
HIDDEN_SIZE = 128
SEQ = 196                 # fixed by the module's .view(-1, 196, H)
DROPOUT_P = 0.5


def _round_up(x, m):
    return ((x + m - 1) // m) * m


def _dropout_keep_mask(shape, row0, hidden, seed_u32):
    """Bernoulli(0.5) keep-mask from a splitmix32 hash of the global element id.

    Pure vector ops (iota/add/mul/xor/shift/compare) -> lowers on Mosaic and
    runs under the interpreter; mask is independent of the tile size.
    """
    rows = jax.lax.broadcasted_iota(jnp.int32, shape, 0)
    cols = jax.lax.broadcasted_iota(jnp.int32, shape, 1)
    gid = ((rows + row0) * hidden + cols).astype(jnp.uint32)
    z = gid + seed_u32 * jnp.uint32(0x9E3779B9)
    z = (z ^ (z >> 16)) * jnp.uint32(0x85EBCA6B)
    z = (z ^ (z >> 13)) * jnp.uint32(0xC2B2AE35)
    z = z ^ (z >> 16)
    return (z >> 31) == 0


def _img_emb_kernel(seed_ref, x_ref, w_ref, b_ref, o_ref, *, training, tm):
    # x_ref: (tm, F)  w_ref: (F, H)  b_ref: (1, H)  o_ref: (tm, H)
    y = jnp.dot(x_ref[...], w_ref[...], preferred_element_type=jnp.float32)
    y = y + b_ref[...]                 # broadcast (1, H) over rows
    y = jnp.tanh(y)
    if training:
        i = pl.program_id(0)
        keep = _dropout_keep_mask(y.shape, i * tm, o_ref.shape[-1],
                                  seed_ref[0].astype(jnp.uint32))
        y = jnp.where(keep, y * (1.0 / (1.0 - DROPOUT_P)), 0.0)
    o_ref[...] = y.astype(o_ref.dtype)


def image_embedding(x, w, b, *, seed=0, training=True, tm=2048):
    """x: (B, 196, F) float32; w: (F, H); b: (H,). Returns (B, 196, H) float32."""
    B = x.shape[0]
    F, H = w.shape
    assert x.shape[1] == SEQ and x.shape[2] == F
    N = B * SEQ

    # Clamp the row tile to the (8-aligned) problem size so small batches do
    # not over-allocate VMEM; large batches get the full 2048-row tile.
    tm = max(8, min(tm, _round_up(N, 8)))

    x2d = x.reshape(N, F)
    b2d = b.reshape(1, H)
    seed_arr = jnp.array([seed], dtype=jnp.int32)

    kernel = functools.partial(_img_emb_kernel, training=training, tm=tm)

    out2d = pl.pallas_call(
        kernel,
        out_shape=jax.ShapeDtypeStruct((N, H), jnp.float32),
        grid_spec=pltpu.PrefetchScalarGridSpec(
            num_scalar_prefetch=1,                      # seed lands in SMEM
            grid=(pl.cdiv(N, tm),),                     # partial last tile OK
            in_specs=[
                pl.BlockSpec((tm, F), lambda i, seed: (i, 0)),   # x row tile
                pl.BlockSpec((F, H), lambda i, seed: (0, 0)),    # weight (resident)
                pl.BlockSpec((1, H), lambda i, seed: (0, 0)),    # bias (resident)
            ],
            out_specs=pl.BlockSpec((tm, H), lambda i, seed: (i, 0)),
        ),
        compiler_params=pltpu.CompilerParams(
            # Row tiles are independent (no accumulator): safe to shard the
            # grid across TensorCores on v7x; no-op on v5e/v6e.
            dimension_semantics=("parallel",)),
    )(seed_arr, x2d, w, b2d)

    return out2d.reshape(B, SEQ, H)


def reference_no_dropout(x, w, b):
    """Plain-JAX reference of Linear + Tanh (dropout off / eval mode)."""
    B = x.shape[0]
    F = w.shape[0]
    y = jnp.tanh(x.reshape(-1, F) @ w + b)
    return y.reshape(B, SEQ, -1)


if __name__ == "__main__":
    key = jax.random.PRNGKey(0)
    k_x, k_w, k_b = jax.random.split(key, 3)

    B = 2
    x = jax.random.normal(k_x, (B, SEQ, IMG_FEATURES), dtype=jnp.float32)

    # Deterministic parameter init mirroring nn.Linear's U(-1/sqrt(F), 1/sqrt(F)).
    bound = 1.0 / (IMG_FEATURES ** 0.5)
    w = jax.random.uniform(k_w, (IMG_FEATURES, HIDDEN_SIZE),
                           minval=-bound, maxval=bound, dtype=jnp.float32)
    b = jax.random.uniform(k_b, (HIDDEN_SIZE,),
                           minval=-bound, maxval=bound, dtype=jnp.float32)

    # Eval mode (dropout off) must match the plain-JAX reference.
    out_eval = jax.block_until_ready(image_embedding(x, w, b, training=False))
    ref = reference_no_dropout(x, w, b)
    assert out_eval.shape == (B, SEQ, HIDDEN_SIZE)
    assert jnp.allclose(out_eval, ref, atol=1e-5, rtol=1e-5)

    # Training mode: every output element is either dropped (exactly 0) or the
    # eval value scaled by 1/(1-p) = 2, and roughly half are kept.
    out_train = jax.block_until_ready(
        image_embedding(x, w, b, seed=1234, training=True))
    assert out_train.shape == (B, SEQ, HIDDEN_SIZE)
    ok = jnp.isclose(out_train, 2.0 * out_eval, atol=1e-5) | (out_train == 0.0)
    assert bool(jnp.all(ok))
    keep_frac = float(jnp.mean((out_train != 0.0).astype(jnp.float32)))
    assert 0.3 < keep_frac < 0.7

    print("KERNEL_OK")
</pallas_src>

<mosaic_0001>
module attributes {stable_mosaic.version = 11 : i64} {
  func.func @_img_emb_kernel(%arg0: i32, %arg1: memref<1xi32, #tpu.memory_space<smem>>, %arg2: memref<392x512xf32, #tpu.memory_space<vmem>>, %arg3: memref<512x128xf32, #tpu.memory_space<vmem>>, %arg4: memref<1x128xf32, #tpu.memory_space<vmem>>, %arg5: memref<392x128xf32, #tpu.memory_space<vmem>>) attributes {dimension_semantics = [#tpu.dimension_semantics<parallel>], iteration_bounds = array<i64: 1>, scalar_prefetch = 1 : i64, scratch_operands = 0 : i64, tpu.core_type = #tpu.core_type<tc>, window_params = [{transform_indices = @transform_0, window_bounds = array<i64: 392, 512>}, {pipeline_mode = #tpu.pipeline_mode<synchronous>, transform_indices = @transform_1, window_bounds = array<i64: 512, 128>}, {pipeline_mode = #tpu.pipeline_mode<synchronous>, transform_indices = @transform_2, window_bounds = array<i64: 1, 128>}, {transform_indices = @transform_3, window_bounds = array<i64: 392, 128>}]} {
    %c0 = arith.constant 0 : index
    %c0_0 = arith.constant 0 : index
    %0 = vector.load %arg2[%c0, %c0_0] : memref<392x512xf32, #tpu.memory_space<vmem>>, vector<392x512xf32>
    %c0_1 = arith.constant 0 : index
    %c0_2 = arith.constant 0 : index
    %1 = vector.load %arg3[%c0_1, %c0_2] : memref<512x128xf32, #tpu.memory_space<vmem>>, vector<512x128xf32>
    %cst = arith.constant dense<0.000000e+00> : vector<392x128xf32>
    %2 = tpu.matmul %0, %1, %cst {dimension_numbers = #tpu.dot_dimension_numbers<[1], [0], [0], [1], [0, 0, 1, 1], [], []>} : vector<392x512xf32>, vector<512x128xf32>, vector<392x128xf32> -> vector<392x128xf32>
    %c0_3 = arith.constant 0 : index
    %c0_4 = arith.constant 0 : index
    %3 = vector.load %arg4[%c0_3, %c0_4] : memref<1x128xf32, #tpu.memory_space<vmem>>, vector<1x128xf32>
    %4 = vector.broadcast %3 : vector<1x128xf32> to vector<392x128xf32>
    %5 = arith.addf %2, %4 : vector<392x128xf32>
    %6 = math.tanh %5 : vector<392x128xf32>
    %c0_5 = arith.constant 0 : index
    %c0_6 = arith.constant 0 : index
    %7 = vector.load %arg5[%c0_5, %c0_6] : memref<392x128xf32, #tpu.memory_space<vmem>>, vector<392x128xf32>
    tpu.vector_store %arg5[%c0_5, %c0_6], %6 {strides = array<i32>} : memref<392x128xf32, #tpu.memory_space<vmem>>, vector<392x128xf32>,
    return
  }
  func.func @transform_0(%arg0: i32, %arg1: memref<1xi32, #tpu.memory_space<smem>>) -> (i32, i32) {
    %c0_i32 = arith.constant 0 : i32
    %c0_i32_0 = arith.constant 0 : i32
    return %arg0, %c0_i32 : i32, i32
  }
  func.func @transform_1(%arg0: i32, %arg1: memref<1xi32, #tpu.memory_space<smem>>) -> (i32, i32) {
    %c0_i32 = arith.constant 0 : i32
    %c0_i32_0 = arith.constant 0 : i32
    %c0_i32_1 = arith.constant 0 : i32
    return %c0_i32, %c0_i32_0 : i32, i32
  }
  func.func @transform_2(%arg0: i32, %arg1: memref<1xi32, #tpu.memory_space<smem>>) -> (i32, i32) {
    %c0_i32 = arith.constant 0 : i32
    %c0_i32_0 = arith.constant 0 : i32
    %c0_i32_1 = arith.constant 0 : i32
    return %c0_i32, %c0_i32_0 : i32, i32
  }
  func.func @transform_3(%arg0: i32, %arg1: memref<1xi32, #tpu.memory_space<smem>>) -> (i32, i32) {
    %c0_i32 = arith.constant 0 : i32
    %c0_i32_0 = arith.constant 0 : i32
    return %arg0, %c0_i32 : i32, i32
  }
}

</mosaic_0001>

<bundles_post_ra>
// kernel: tpu_custom_call.1
= control target key start
LH: loop header
LB: loop body
LE: loop exit
PB: predicated region body
PF: predicated region fallthrough
CT: control target
= control target key end

     0   :  { %10 = vsyncpa [#allocation5], 0  ;;  %s1582_s0 = inlined_call_operand.<no memory space> [shape: s32[1], index: 0, kind: input, shape index: {}]   ;;  %s1583_s1 = inlined_call_operand.hbm [shape: f32[392,512], index: 1, kind: input, shape index: {}]   ;;  %s1584_s2 = inlined_call_operand.hbm [shape: f32[512,128], index: 2, kind: input, shape index: {}]   ;;  %s1585_s3 = inlined_call_operand.vmem [shape: f32[1,128], index: 3, kind: input, shape index: {}]   ;;  %s1586_s4 = inlined_call_operand.hbm [shape: f32[392,128], index: 4, kind: output, shape index: {}]  }
   0x1   :  { %11 = vsyncpa [#allocation8], 0 }
   0x2   :  { %12 = vsyncpa [#allocation6], 0  ;;  %s1421_s15 = smov [#allocation4]   ;;  %s1349_s18 = scalar_lea.hbm %s1583_s1, 25088 }
   0x3   :  { %s18_s16 = sshll.u32 %s1421_s15, 4  ;;  %p1350_p0 = scmp.ne.s32.totalorder %s1583_s1, %s1349_s18  ;;  %s19_s16 = int_to_ptr.vmem [resolvable:$true] %s18_s16 }
   0x4   :  { %p1353_p1 = scmp.lt.u32.totalorder %s1349_s18, %s1583_s1 }
   0x6   :  { %p1355_p2 = pnand %p1353_p1, %p1350_p0 }
   0x8   :  { %1358 = shalt.err (!%p1355_p2)
}
   0x9   :  { %s1359_s23 = scalar_lea.vmem %s19_s16, 25088  ;;  %p1364_p4 = scmp.lt.s32.totalorder %s19_s16, %s19_s16 }
   0xa   :  { %p1360_p3 = scmp.ne.s32.totalorder %s19_s16, %s1359_s23  ;;  %p1365_p5 = scmp.lt.s32.totalorder %s1359_s23, %s1359_s23 }
   0xc   :  { %p1366_p6 = por %p1365_p5, %p1364_p4 }
   0xe   :  { %p1367_p7 = pnand %p1366_p6, %p1360_p3 }
  0x10   :  { %1370 = shalt.err (!%p1367_p7)
}
  0x11   :  { %s1422_s24 = smov 512   ;;  %s1423_s25 = smov 32  }
  0x12   :  { %24 = dma.hbm_to_vmem [thread:$0]  %s1583_s1, 25088, %s19_s16, [#allocation5], %s1422_s24, %s1422_s24, %s1423_s25  }
  0x13   :  { %s1424_s28 = smov [#allocation7]   ;;  %s1371_s6 = scalar_lea.hbm %s1584_s2, 8192 }
  0x14   :  { %s30_s29 = sshll.u32 %s1424_s28, 4  ;;  %p1372_p8 = scmp.ne.s32.totalorder %s1584_s2, %s1371_s6  ;;  %s31_s29 = int_to_ptr.vmem [resolvable:$true] %s30_s29 }
  0x15   :  { %p1375_p9 = scmp.lt.u32.totalorder %s1371_s6, %s1584_s2 }
  0x17   :  { %p1377_p10 = pnand %p1375_p9, %p1372_p8 }
  0x19   :  { %1380 = shalt.err (!%p1377_p10)
}
  0x1a   :  { %s1381_s11 = scalar_lea.vmem %s31_s29, 8192  ;;  %p1386_p12 = scmp.lt.s32.totalorder %s31_s29, %s31_s29 }
  0x1b   :  { %p1382_p11 = scmp.ne.s32.totalorder %s31_s29, %s1381_s11  ;;  %p1387_p13 = scmp.lt.s32.totalorder %s1381_s11, %s1381_s11 }
  0x1d   :  { %p1388_p0 = por %p1387_p13, %p1386_p12 }
  0x1f   :  { %p1389_p1 = pnand %p1388_p0, %p1382_p11 }
  0x21   :  { %1392 = shalt.err (!%p1389_p1)
}
  0x22   :  { %s1425_s1 = smov 128   ;;  %s1426_s12 = smov 8  }
  0x23   :  { %36 = dma.hbm_to_vmem [thread:$0]  %s1584_s2, 8192, %s31_s29, [#allocation8], %s1425_s1, %s1425_s1, %s1426_s12  }
  0x24   :  { %1415 = dma.done.wait [#allocation5], 25088  }
  0x25   :  { %1416 = vsyncadd [#allocation5], 4294942208 }
  0x26   :  { %1417 = dma.done.wait [#allocation8], 8192  }
  0x27   :  { %1418 = vsyncadd [#allocation8], 4294959104  ;;  %v1427_v0 = vmov 0.0|0.0   ;;  %v241_v1 = vld [vmem:[#allocation7] sm:$0xff]  ;;  %v242_v2 = vld [vmem:[#allocation7 + $0x8] sm:$0xff] }
  0x28   :  { %1049 = vmatprep.subr.bf16.mxu1 %v1427_v0  ;;  %1097 = vmatprep.subr.bf16.mxu0 %v1427_v0  ;;  %v273_v3 = vld [vmem:[#allocation7 + $0x100] sm:$0xff]  ;;  %v1050_v4 = vpack.c.bf16 %v242_v2, %v241_v1  ;;  %v274_v5 = vld [vmem:[#allocation7 + $0x108] sm:$0xff]  ;;  %v243_v6 = vld [vmem:[#allocation7 + $0x10] sm:$0xff] }
  0x29   :  { %v244_v7 = vld [vmem:[#allocation7 + $0x18] sm:$0xff]  ;;  %v1098_v8 = vpack.c.bf16 %v274_v5, %v273_v3  ;;  %v275_v9 = vld [vmem:[#allocation7 + $0x110] sm:$0xff]  ;;  %v245_v13 = vld [vmem:[#allocation7 + $0x20] sm:$0xff] }
  0x2a   :  { %v276_v10 = vld [vmem:[#allocation7 + $0x118] sm:$0xff]  ;;  %1051 = vmatpush1.bf16.msra.mxu1 %v1050_v4  ;;  %v1053_v11 = vpack.c.bf16 %v244_v7, %v243_v6  ;;  %v246_v14 = vld [vmem:[#allocation7 + $0x28] sm:$0xff]  ;;  %v277_v15 = vld [vmem:[#allocation7 + $0x120] sm:$0xff] }
  0x2b   :  { %1099 = vmatpush1.bf16.msra.mxu0 %v1098_v8  ;;  %1052 = vmatprep.subr.bf16.mxu1 %v1427_v0  ;;  %v1101_v12 = vpack.c.bf16 %v276_v10, %v275_v9  ;;  %v278_v16 = vld [vmem:[#allocation7 + $0x128] sm:$0xff]  ;;  %v1056_v17 = vpack.c.bf16 %v246_v14, %v245_v13  ;;  %v247_v19 = vld [vmem:[#allocation7 + $0x30] sm:$0xff]  ;;  %v248_v20 = vld [vmem:[#allocation7 + $0x38] sm:$0xff] }
  0x2c   :  { %1100 = vmatprep.subr.bf16.mxu0 %v1427_v0  ;;  %v1104_v18 = vpack.c.bf16 %v278_v16, %v277_v15  ;;  %v279_v21 = vld [vmem:[#allocation7 + $0x130] sm:$0xff]  ;;  %v280_v22 = vld [vmem:[#allocation7 + $0x138] sm:$0xff]  ;;  %v1059_v23 = vpack.c.bf16 %v248_v20, %v247_v19  ;;  %v249_v25 = vld [vmem:[#allocation7 + $0x40] sm:$0xff] }
  0x2d   :  { %v1107_v24 = vpack.c.bf16 %v280_v22, %v279_v21  ;;  %v250_v26 = vld [vmem:[#allocation7 + $0x48] sm:$0xff]  ;;  %v281_v27 = vld [vmem:[#allocation7 + $0x140] sm:$0xff]  ;;  %v251_v31 = vld [vmem:[#allocation7 + $0x50] sm:$0xff] }
  0x2e   :  { %1054 = vmatpush1.bf16.msra.mxu1 %v1053_v11  ;;  %v282_v28 = vld [vmem:[#allocation7 + $0x148] sm:$0xff]  ;;  %v1062_v29 = vpack.c.bf16 %v250_v26, %v249_v25  ;;  %v252_v32 = vld [vmem:[#allocation7 + $0x58] sm:$0xff]  ;;  %v283_v33 = vld [vmem:[#allocation7 + $0x150] sm:$0xff] }
  0x2f   :  { %1102 = vmatpush1.bf16.msra.mxu0 %v1101_v12  ;;  %1055 = vmatprep.subr.bf16.mxu1 %v1427_v0  ;;  %v1110_v30 = vpack.c.bf16 %v282_v28, %v281_v27  ;;  %v284_v34 = vld [vmem:[#allocation7 + $0x158] sm:$0xff]  ;;  %v1065_v35 = vpack.c.bf16 %v252_v32, %v251_v31  ;;  %v253_v37 = vld [vmem:[#allocation7 + $0x60] sm:$0xff]  ;;  %v254_v38 = vld [vmem:[#allocation7 + $0x68] sm:$0xff] }
  0x30   :  { %1103 = vmatprep.subr.bf16.mxu0 %v1427_v0  ;;  %v1113_v36 = vpack.c.bf16 %v284_v34, %v283_v33  ;;  %v285_v39 = vld [vmem:[#allocation7 + $0x160] sm:$0xff]  ;;  %v286_v40 = vld [vmem:[#allocation7 + $0x168] sm:$0xff]  ;;  %v48_v42 = vld [vmem:[#allocation4 + $0x18] sm:$0xff]  ;;  %v1068_v43 = vpack.c.bf16 %v254_v38, %v253_v37 }
  0x31   :  { %v46_v41 = vld [vmem:[#allocation4 + $0x8] sm:$0xff]  ;;  %686 = vmatprep.mubr.f32.mxu0 %v48_v42  ;;  %v1116_v44 = vpack.c.bf16 %v286_v40, %v285_v39  ;;  %v255_v45 = vld [vmem:[#allocation7 + $0x70] sm:$0xff]  ;;  %v256_v46 = vld [vmem:[#allocation7 + $0x78] sm:$0xff] }
  0x32   :  { %1057 = vmatpush1.bf16.msra.mxu1 %v1056_v17  ;;  %376 = vmatprep.mubr.f32.mxu1 %v46_v41  ;;  %v287_v47 = vld [vmem:[#allocation7 + $0x170] sm:$0xff]  ;;  %v288_v48 = vld [vmem:[#allocation7 + $0x178] sm:$0xff]  ;;  %v1071_v49 = vpack.c.bf16 %v256_v46, %v255_v45  ;;  %v257_v51 = vld [vmem:[#allocation7 + $0x80] sm:$0xff] }
  0x33   :  { %1105 = vmatpush1.bf16.msra.mxu0 %v1104_v18  ;;  %1058 = vmatprep.subr.bf16.mxu1 %v1427_v0  ;;  %v1119_v50 = vpack.c.bf16 %v288_v48, %v287_v47  ;;  %v258_v52 = vld [vmem:[#allocation7 + $0x88] sm:$0xff]  ;;  %v289_v53 = vld [vmem:[#allocation7 + $0x180] sm:$0xff]  ;;  %v259_v57 = vld [vmem:[#allocation7 + $0x90] sm:$0xff] }
  0x34   :  { %1106 = vmatprep.subr.bf16.mxu0 %v1427_v0  ;;  %v290_v54 = vld [vmem:[#allocation7 + $0x188] sm:$0xff]  ;;  %v1074_v55 = vpack.c.bf16 %v258_v52, %v257_v51  ;;  %v260_v58 = vld [vmem:[#allocation7 + $0x98] sm:$0xff]  ;;  %v291_v59 = vld [vmem:[#allocation7 + $0x190] sm:$0xff] }
  0x35   :  { %v1122_v56 = vpack.c.bf16 %v290_v54, %v289_v53  ;;  %v292_v60 = vld [vmem:[#allocation7 + $0x198] sm:$0xff]  ;;  %v1077_v61 = vpack.c.bf16 %v260_v58, %v259_v57  ;;  %v261_v63 = vld [vmem:[#allocation7 + $0xa0] sm:$0xff]  ;;  %v262_v1 = vld [vmem:[#allocation7 + $0xa8] sm:$0xff] }
  0x36   :  { %1060 = vmatpush1.bf16.msra.mxu1 %v1059_v23  ;;  %v1125_v62 = vpack.c.bf16 %v292_v60, %v291_v59  ;;  %v293_v2 = vld [vmem:[#allocation7 + $0x1a0] sm:$0xff]  ;;  %v294_v3 = vld [vmem:[#allocation7 + $0x1a8] sm:$0xff]  ;;  %v1080_v4 = vpack.c.bf16 %v262_v1, %v261_v63  ;;  %v263_v6 = vld [vmem:[#allocation7 + $0xb0] sm:$0xff] }
  0x37   :  { %1108 = vmatpush1.bf16.msra.mxu0 %v1107_v24  ;;  %1061 = vmatprep.subr.bf16.mxu1 %v1427_v0  ;;  %v1128_v5 = vpack.c.bf16 %v294_v3, %v293_v2  ;;  %v264_v7 = vld [vmem:[#allocation7 + $0xb8] sm:$0xff]  ;;  %v295_v8 = vld [vmem:[#allocation7 + $0x1b0] sm:$0xff]  ;;  %v265_v12 = vld [vmem:[#allocation7 + $0xc0] sm:$0xff] }
  0x38   :  { %1109 = vmatprep.subr.bf16.mxu0 %v1427_v0  ;;  %v296_v9 = vld [vmem:[#allocation7 + $0x1b8] sm:$0xff]  ;;  %v1083_v10 = vpack.c.bf16 %v264_v7, %v263_v6  ;;  %v266_v13 = vld [vmem:[#allocation7 + $0xc8] sm:$0xff]  ;;  %v297_v14 = vld [vmem:[#allocation7 + $0x1c0] sm:$0xff] }
  0x39   :  { %v1131_v11 = vpack.c.bf16 %v296_v9, %v295_v8  ;;  %v298_v15 = vld [vmem:[#allocation7 + $0x1c8] sm:$0xff]  ;;  %v1086_v16 = vpack.c.bf16 %v266_v13, %v265_v12  ;;  %v267_v18 = vld [vmem:[#allocation7 + $0xd0] sm:$0xff]  ;;  %v268_v19 = vld [vmem:[#allocation7 + $0xd8] sm:$0xff] }
  0x3a   :  { %1063 = vmatpush1.bf16.msra.mxu1 %v1062_v29  ;;  %v1134_v17 = vpack.c.bf16 %v298_v15, %v297_v14  ;;  %v299_v20 = vld [vmem:[#allocation7 + $0x1d0] sm:$0xff]  ;;  %v300_v21 = vld [vmem:[#allocation7 + $0x1d8] sm:$0xff]  ;;  %v1089_v22 = vpack.c.bf16 %v268_v19, %v267_v18  ;;  %v269_v24 = vld [vmem:[#allocation7 + $0xe0] sm:$0xff] }
  0x3b   :  { %1111 = vmatpush1.bf16.msra.mxu0 %v1110_v30  ;;  %1064 = vmatprep.subr.bf16.mxu1 %v1427_v0  ;;  %v1137_v23 = vpack.c.bf16 %v300_v21, %v299_v20  ;;  %v270_v25 = vld [vmem:[#allocation7 + $0xe8] sm:$0xff]  ;;  %v301_v26 = vld [vmem:[#allocation7 + $0x1e0] sm:$0xff]  ;;  %v271_v30 = vld [vmem:[#allocation7 + $0xf0] sm:$0xff] }
  0x3c   :  { %1112 = vmatprep.subr.bf16.mxu0 %v1427_v0  ;;  %v302_v27 = vld [vmem:[#allocation7 + $0x1e8] sm:$0xff]  ;;  %v1092_v28 = vpack.c.bf16 %v270_v25, %v269_v24  ;;  %v272_v31 = vld [vmem:[#allocation7 + $0xf8] sm:$0xff]  ;;  %v303_v32 = vld [vmem:[#allocation7 + $0x1f0] sm:$0xff] }
  0x3d   :  { %v1140_v29 = vpack.c.bf16 %v302_v27, %v301_v26  ;;  %v304_v33 = vld [vmem:[#allocation7 + $0x1f8] sm:$0xff]  ;;  %v1095_v34 = vpack.c.bf16 %v272_v31, %v271_v30  ;;  %v47_v37 = vld [vmem:[#allocation4 + $0x10] sm:$0xff]  ;;  %v50_v38 = vld [vmem:[#allocation4 + $0x28] sm:$0xff] }
  0x3e   :  { %1066 = vmatpush1.bf16.msra.mxu1 %v1065_v35  ;;  %v1143_v35 = vpack.c.bf16 %v304_v33, %v303_v32  ;;  %v52_v39 = vld [vmem:[#allocation4 + $0x38] sm:$0xff]  ;;  %v49_v40 = vld [vmem:[#allocation4 + $0x20] sm:$0xff]  ;;  %v51_v41 = vld [vmem:[#allocation4 + $0x30] sm:$0xff] }
  0x3f   :  { %1114 = vmatpush1.bf16.msra.mxu0 %v1113_v36  ;;  %1067 = vmatprep.subr.bf16.mxu1 %v1427_v0  ;;  %v45_v36 = vld [vmem:[#allocation4] sm:$0xff]  ;;  %v54_v42 = vld [vmem:[#allocation4 + $0x48] sm:$0xff]  ;;  %v60_v46 = vld [vmem:[#allocation4 + $0x78] sm:$0xff] }
  0x40   :  { %1115 = vmatprep.subr.bf16.mxu0 %v1427_v0  ;;  %v58_v45 = vld [vmem:[#allocation4 + $0x68] sm:$0xff]  ;;  %v57_v47 = vld [vmem:[#allocation4 + $0x60] sm:$0xff]  ;;  %v59_v48 = vld [vmem:[#allocation4 + $0x70] sm:$0xff] }
  0x41   :  { %v61_v51 = vld [vmem:[#allocation4 + $0x80] sm:$0xff]  ;;  %v63_v52 = vld [vmem:[#allocation4 + $0x90] sm:$0xff]  ;;  %v66_v53 = vld [vmem:[#allocation4 + $0xa8] sm:$0xff] }
  0x42   :  { %1069 = vmatpush1.bf16.msra.mxu1 %v1068_v43  ;;  %v56_v43 = vld [vmem:[#allocation4 + $0x58] sm:$0xff]  ;;  %v70_v57 = vld [vmem:[#allocation4 + $0xc8] sm:$0xff]  ;;  %v69_v59 = vld [vmem:[#allocation4 + $0xc0] sm:$0xff] }
  0x43   :  { %1117 = vmatpush1.bf16.msra.mxu0 %v1116_v44  ;;  %1070 = vmatprep.subr.bf16.mxu1 %v1427_v0  ;;  %v53_v44 = vld [vmem:[#allocation4 + $0x40] sm:$0xff]  ;;  %v68_v54 = vld [vmem:[#allocation4 + $0xb8] sm:$0xff]  ;;  %v71_v60 = vld [vmem:[#allocation4 + $0xd0] sm:$0xff] }
  0x44   :  { %1118 = vmatprep.subr.bf16.mxu0 %v1427_v0  ;;  %v72_v58 = vld [vmem:[#allocation4 + $0xd8] sm:$0xff]  ;;  %v73_v63 = vld [vmem:[#allocation4 + $0xe0] sm:$0xff]  ;;  %v75_v1 = vld [vmem:[#allocation4 + $0xf0] sm:$0xff] }
  0x45   :  { %v78_v2 = vld [vmem:[#allocation4 + $0x108] sm:$0xff]  ;;  %v80_v3 = vld [vmem:[#allocation4 + $0x118] sm:$0xff]  ;;  %v81_v8 = vld [vmem:[#allocation4 + $0x120] sm:$0xff] }
  0x46   :  { %1072 = vmatpush1.bf16.msra.mxu1 %v1071_v49  ;;  %v62_v49 = vld [vmem:[#allocation4 + $0x88] sm:$0xff]  ;;  %v84_v7 = vld [vmem:[#allocation4 + $0x138] sm:$0xff]  ;;  %v83_v9 = vld [vmem:[#allocation4 + $0x130] sm:$0xff] }
  0x47   :  { %1120 = vmatpush1.bf16.msra.mxu0 %v1119_v50  ;;  %1073 = vmatprep.subr.bf16.mxu1 %v1427_v0  ;;  %v64_v50 = vld [vmem:[#allocation4 + $0x98] sm:$0xff]  ;;  %v82_v6 = vld [vmem:[#allocation4 + $0x128] sm:$0xff]  ;;  %v85_v12 = vld [vmem:[#allocation4 + $0x140] sm:$0xff] }
  0x48   :  { %1121 = vmatprep.subr.bf16.mxu0 %v1427_v0  ;;  %v87_v13 = vld [vmem:[#allocation4 + $0x150] sm:$0xff]  ;;  %v90_v14 = vld [vmem:[#allocation4 + $0x168] sm:$0xff]  ;;  %v92_v15 = vld [vmem:[#allocation4 + $0x178] sm:$0xff] }
  0x49   :  { %v94_v18 = vld [vmem:[#allocation4 + $0x188] sm:$0xff]  ;;  %v96_v19 = vld [vmem:[#allocation4 + $0x198] sm:$0xff]  ;;  %v93_v20 = vld [vmem:[#allocation4 + $0x180] sm:$0xff] }
  0x4a   :  { %1075 = vmatpush1.bf16.msra.mxu1 %v1074_v55  ;;  %v65_v55 = vld [vmem:[#allocation4 + $0xa0] sm:$0xff]  ;;  %v95_v21 = vld [vmem:[#allocation4 + $0x190] sm:$0xff]  ;;  %v102_v26 = vld [vmem:[#allocation4 + $0x1c8] sm:$0xff] }
  0x4b   :  { %1123 = vmatpush1.bf16.msra.mxu0 %v1122_v56  ;;  %1076 = vmatprep.subr.bf16.mxu1 %v1427_v0  ;;  %v67_v56 = vld [vmem:[#allocation4 + $0xb0] sm:$0xff]  ;;  %v97_v24 = vld [vmem:[#allocation4 + $0x1a0] sm:$0xff]  ;;  %v104_v27 = vld [vmem:[#allocation4 + $0x1d8] sm:$0xff] }
  0x4c   :  { %1124 = vmatprep.subr.bf16.mxu0 %v1427_v0  ;;  %v99_v25 = vld [vmem:[#allocation4 + $0x1b0] sm:$0xff]  ;;  %v106_v30 = vld [vmem:[#allocation4 + $0x1e8] sm:$0xff]  ;;  %v108_v31 = vld [vmem:[#allocation4 + $0x1f8] sm:$0xff] }
  0x4d   :  { %v105_v32 = vld [vmem:[#allocation4 + $0x1e0] sm:$0xff]  ;;  %v107_v33 = vld [vmem:[#allocation4 + $0x1f0] sm:$0xff] }
  0x4e   :  { %1078 = vmatpush1.bf16.msra.mxu1 %v1077_v61  ;;  %v74_v61 = vld [vmem:[#allocation4 + $0xe8] sm:$0xff] }
  0x4f   :  { %1126 = vmatpush1.bf16.msra.mxu0 %v1125_v62  ;;  %1079 = vmatprep.subr.bf16.mxu1 %v1427_v0  ;;  %v76_v62 = vld [vmem:[#allocation4 + $0xf8] sm:$0xff] }
  0x50   :  { %1127 = vmatprep.subr.bf16.mxu0 %v1427_v0 }
  0x52   :  { %1081 = vmatpush1.bf16.msra.mxu1 %v1080_v4  ;;  %v77_v4 = vld [vmem:[#allocation4 + $0x100] sm:$0xff] }
  0x53   :  { %1129 = vmatpush1.bf16.msra.mxu0 %v1128_v5  ;;  %1082 = vmatprep.subr.bf16.mxu1 %v1427_v0  ;;  %v79_v5 = vld [vmem:[#allocation4 + $0x110] sm:$0xff] }
  0x54   :  { %1130 = vmatprep.subr.bf16.mxu0 %v1427_v0 }
  0x56   :  { %1084 = vmatpush1.bf16.msra.mxu1 %v1083_v10  ;;  %v86_v10 = vld [vmem:[#allocation4 + $0x148] sm:$0xff] }
  0x57   :  { %1132 = vmatpush1.bf16.msra.mxu0 %v1131_v11  ;;  %1085 = vmatprep.subr.bf16.mxu1 %v1427_v0  ;;  %v88_v11 = vld [vmem:[#allocation4 + $0x158] sm:$0xff] }
  0x58   :  { %1133 = vmatprep.subr.bf16.mxu0 %v1427_v0 }
  0x5a   :  { %1087 = vmatpush1.bf16.msra.mxu1 %v1086_v16  ;;  %v89_v16 = vld [vmem:[#allocation4 + $0x160] sm:$0xff] }
  0x5b   :  { %1135 = vmatpush1.bf16.msra.mxu0 %v1134_v17  ;;  %1088 = vmatprep.subr.bf16.mxu1 %v1427_v0  ;;  %v91_v17 = vld [vmem:[#allocation4 + $0x170] sm:$0xff] }
  0x5c   :  { %1136 = vmatprep.subr.bf16.mxu0 %v1427_v0 }
  0x5e   :  { %1090 = vmatpush1.bf16.msra.mxu1 %v1089_v22  ;;  %v98_v22 = vld [vmem:[#allocation4 + $0x1a8] sm:$0xff] }
  0x5f   :  { %1138 = vmatpush1.bf16.msra.mxu0 %v1137_v23  ;;  %1091 = vmatprep.subr.bf16.mxu1 %v1427_v0  ;;  %v100_v23 = vld [vmem:[#allocation4 + $0x1b8] sm:$0xff] }
  0x60   :  { %1139 = vmatprep.subr.bf16.mxu0 %v1427_v0 }
  0x62   :  { %1093 = vmatpush1.bf16.msra.mxu1 %v1092_v28  ;;  %v101_v28 = vld [vmem:[#allocation4 + $0x1c0] sm:$0xff] }
  0x63   :  { %1141 = vmatpush1.bf16.msra.mxu0 %v1140_v29  ;;  %1094 = vmatprep.subr.bf16.mxu1 %v1427_v0  ;;  %v103_v29 = vld [vmem:[#allocation4 + $0x1d0] sm:$0xff] }
  0x64   :  { %1142 = vmatprep.subr.bf16.mxu0 %v1427_v0  ;;  %v55_v0 = vld [vmem:[#allocation4 + $0x50] sm:$0xff] }
  0x66   :  { %1096 = vmatpush1.bf16.msra.mxu1 %v1095_v34  ;;  %v110_v34 = vld [vmem:[#allocation4 + $0x208] sm:$0xff] }
  0x67   :  { %1144 = vmatpush1.bf16.msra.mxu0 %v1143_v35  ;;  %v112_v35 = vld [vmem:[#allocation4 + $0x218] sm:$0xff] }
  0x69   :  { %377 = vmatmul.mubr.f32.vlgmr.msra.gmra.mrb[0].mxu1 %v45_v36  ;;  %v109_v36 = vld [vmem:[#allocation4 + $0x200] sm:$0xff] }
  0x6a   :  { %687 = vmatmul.mubr.f32.vlgmr.msra.gmra.mrb[0].mxu0 %v47_v37  ;;  %381 = vmatprep.mubr.f32.mxu1 %v50_v38  ;;  %v111_v37 = vld [vmem:[#allocation4 + $0x210] sm:$0xff]  ;;  %v114_v38 = vld [vmem:[#allocation4 + $0x228] sm:$0xff] }
  0x6b   :  { %691 = vmatprep.mubr.f32.mxu0 %v52_v39  ;;  %v116_v39 = vld [vmem:[#allocation4 + $0x238] sm:$0xff] }
  0x6d   :  { %382 = vmatmul.mubr.f32.gmra.mrb[2].mxu1 %v49_v40  ;;  %v113_v40 = vld [vmem:[#allocation4 + $0x220] sm:$0xff] }
  0x6e   :  { %692 = vmatmul.mubr.f32.gmra.mrb[2].mxu0 %v51_v41  ;;  %386 = vmatprep.mubr.f32.mxu1 %v54_v42  ;;  %v115_v41 = vld [vmem:[#allocation4 + $0x230] sm:$0xff]  ;;  %v118_v42 = vld [vmem:[#allocation4 + $0x248] sm:$0xff] }
  0x6f   :  { %696 = vmatprep.mubr.f32.mxu0 %v56_v43  ;;  %v120_v43 = vld [vmem:[#allocation4 + $0x258] sm:$0xff] }
  0x71   :  { %387 = vmatmul.mubr.f32.gmra.mrb[4].mxu1 %v53_v44  ;;  %v117_v44 = vld [vmem:[#allocation4 + $0x240] sm:$0xff] }
  0x72   :  { %697 = vmatmul.mubr.f32.gmra.mrb[4].mxu0 %v55_v0  ;;  %391 = vmatprep.mubr.f32.mxu1 %v58_v45  ;;  %v119_v0 = vld [vmem:[#allocation4 + $0x250] sm:$0xff]  ;;  %v122_v45 = vld [vmem:[#allocation4 + $0x268] sm:$0xff] }
  0x73   :  { %701 = vmatprep.mubr.f32.mxu0 %v60_v46  ;;  %v124_v46 = vld [vmem:[#allocation4 + $0x278] sm:$0xff] }
  0x75   :  { %392 = vmatmul.mubr.f32.gmra.mrb[6].mxu1 %v57_v47  ;;  %v121_v47 = vld [vmem:[#allocation4 + $0x260] sm:$0xff] }
  0x76   :  { %702 = vmatmul.mubr.f32.gmra.mrb[6].mxu0 %v59_v48  ;;  %396 = vmatprep.mubr.f32.mxu1 %v62_v49  ;;  %v123_v48 = vld [vmem:[#allocation4 + $0x270] sm:$0xff]  ;;  %v126_v49 = vld [vmem:[#allocation4 + $0x288] sm:$0xff] }
  0x77   :  { %706 = vmatprep.mubr.f32.mxu0 %v64_v50  ;;  %v128_v50 = vld [vmem:[#allocation4 + $0x298] sm:$0xff] }
  0x79   :  { %397 = vmatmul.mubr.f32.gmra.mrb[8].mxu1 %v61_v51  ;;  %v125_v51 = vld [vmem:[#allocation4 + $0x280] sm:$0xff] }
  0x7a   :  { %707 = vmatmul.mubr.f32.gmra.mrb[8].mxu0 %v63_v52  ;;  %401 = vmatprep.mubr.f32.mxu1 %v66_v53  ;;  %v127_v52 = vld [vmem:[#allocation4 + $0x290] sm:$0xff]  ;;  %v130_v53 = vld [vmem:[#allocation4 + $0x2a8] sm:$0xff] }
  0x7b   :  { %711 = vmatprep.mubr.f32.mxu0 %v68_v54  ;;  %v132_v54 = vld [vmem:[#allocation4 + $0x2b8] sm:$0xff] }
  0x7d   :  { %402 = vmatmul.mubr.f32.gmra.mrb[10].mxu1 %v65_v55  ;;  %v129_v55 = vld [vmem:[#allocation4 + $0x2a0] sm:$0xff] }
  0x7e   :  { %712 = vmatmul.mubr.f32.gmra.mrb[10].mxu0 %v67_v56  ;;  %406 = vmatprep.mubr.f32.mxu1 %v70_v57  ;;  %v131_v56 = vld [vmem:[#allocation4 + $0x2b0] sm:$0xff]  ;;  %v134_v57 = vld [vmem:[#allocation4 + $0x2c8] sm:$0xff] }
  0x7f   :  { %716 = vmatprep.mubr.f32.mxu0 %v72_v58  ;;  %v136_v58 = vld [vmem:[#allocation4 + $0x2d8] sm:$0xff] }
  0x81   :  { %407 = vmatmul.mubr.f32.gmra.mrb[12].mxu1 %v69_v59  ;;  %v133_v59 = vld [vmem:[#allocation4 + $0x2c0] sm:$0xff] }
  0x82   :  { %717 = vmatmul.mubr.f32.gmra.mrb[12].mxu0 %v71_v60  ;;  %411 = vmatprep.mubr.f32.mxu1 %v74_v61  ;;  %v135_v60 = vld [vmem:[#allocation4 + $0x2d0] sm:$0xff]  ;;  %v138_v61 = vld [vmem:[#allocation4 + $0x2e8] sm:$0xff] }
  0x83   :  { %721 = vmatprep.mubr.f32.mxu0 %v76_v62  ;;  %v140_v62 = vld [vmem:[#allocation4 + $0x2f8] sm:$0xff] }
  0x85   :  { %412 = vmatmul.mubr.f32.gmra.mrb[14].mxu1 %v73_v63  ;;  %v137_v63 = vld [vmem:[#allocation4 + $0x2e0] sm:$0xff] }
  0x86   :  { %722 = vmatmul.mubr.f32.gmra.mrb[14].mxu0 %v75_v1  ;;  %416 = vmatprep.mubr.f32.mxu1 %v78_v2  ;;  %v139_v1 = vld [vmem:[#allocation4 + $0x2f0] sm:$0xff]  ;;  %v142_v2 = vld [vmem:[#allocation4 + $0x308] sm:$0xff] }
  0x87   :  { %726 = vmatprep.mubr.f32.mxu0 %v80_v3  ;;  %v144_v3 = vld [vmem:[#allocation4 + $0x318] sm:$0xff] }
  0x89   :  { %417 = vmatmul.mubr.f32.gmra.mrb[16].mxu1 %v77_v4  ;;  %v141_v4 = vld [vmem:[#allocation4 + $0x300] sm:$0xff] }
  0x8a   :  { %727 = vmatmul.mubr.f32.gmra.mrb[16].mxu0 %v79_v5  ;;  %421 = vmatprep.mubr.f32.mxu1 %v82_v6  ;;  %v143_v5 = vld [vmem:[#allocation4 + $0x310] sm:$0xff]  ;;  %v146_v6 = vld [vmem:[#allocation4 + $0x328] sm:$0xff] }
  0x8b   :  { %731 = vmatprep.mubr.f32.mxu0 %v84_v7  ;;  %v148_v7 = vld [vmem:[#allocation4 + $0x338] sm:$0xff] }
  0x8d   :  { %422 = vmatmul.mubr.f32.gmra.mrb[18].mxu1 %v81_v8  ;;  %v145_v8 = vld [vmem:[#allocation4 + $0x320] sm:$0xff] }
  0x8e   :  { %732 = vmatmul.mubr.f32.gmra.mrb[18].mxu0 %v83_v9  ;;  %426 = vmatprep.mubr.f32.mxu1 %v86_v10  ;;  %v147_v9 = vld [vmem:[#allocation4 + $0x330] sm:$0xff]  ;;  %v150_v10 = vld [vmem:[#allocation4 + $0x348] sm:$0xff] }
  0x8f   :  { %736 = vmatprep.mubr.f32.mxu0 %v88_v11  ;;  %v152_v11 = vld [vmem:[#allocation4 + $0x358] sm:$0xff] }
  0x91   :  { %427 = vmatmul.mubr.f32.gmra.mrb[20].mxu1 %v85_v12  ;;  %v149_v12 = vld [vmem:[#allocation4 + $0x340] sm:$0xff] }
  0x92   :  { %737 = vmatmul.mubr.f32.gmra.mrb[20].mxu0 %v87_v13  ;;  %431 = vmatprep.mubr.f32.mxu1 %v90_v14  ;;  %v151_v13 = vld [vmem:[#allocation4 + $0x350] sm:$0xff]  ;;  %v154_v14 = vld [vmem:[#allocation4 + $0x368] sm:$0xff] }
  0x93   :  { %741 = vmatprep.mubr.f32.mxu0 %v92_v15  ;;  %v156_v15 = vld [vmem:[#allocation4 + $0x378] sm:$0xff] }
  0x95   :  { %432 = vmatmul.mubr.f32.gmra.mrb[22].mxu1 %v89_v16  ;;  %v153_v16 = vld [vmem:[#allocation4 + $0x360] sm:$0xff] }
  0x96   :  { %742 = vmatmul.mubr.f32.gmra.mrb[22].mxu0 %v91_v17  ;;  %436 = vmatprep.mubr.f32.mxu1 %v94_v18  ;;  %v155_v17 = vld [vmem:[#allocation4 + $0x370] sm:$0xff]  ;;  %v158_v18 = vld [vmem:[#allocation4 + $0x388] sm:$0xff] }
  0x97   :  { %746 = vmatprep.mubr.f32.mxu0 %v96_v19  ;;  %v160_v19 = vld [vmem:[#allocation4 + $0x398] sm:$0xff] }
  0x99   :  { %437 = vmatmul.mubr.f32.gmra.mrb[24].mxu1 %v93_v20  ;;  %v157_v20 = vld [vmem:[#allocation4 + $0x380] sm:$0xff] }
  0x9a   :  { %747 = vmatmul.mubr.f32.gmra.mrb[24].mxu0 %v95_v21  ;;  %441 = vmatprep.mubr.f32.mxu1 %v98_v22  ;;  %v159_v21 = vld [vmem:[#allocation4 + $0x390] sm:$0xff]  ;;  %v162_v22 = vld [vmem:[#allocation4 + $0x3a8] sm:$0xff] }
  0x9b   :  { %751 = vmatprep.mubr.f32.mxu0 %v100_v23  ;;  %v164_v23 = vld [vmem:[#allocation4 + $0x3b8] sm:$0xff] }
  0x9d   :  { %442 = vmatmul.mubr.f32.gmra.mrb[26].mxu1 %v97_v24  ;;  %v161_v24 = vld [vmem:[#allocation4 + $0x3a0] sm:$0xff] }
  0x9e   :  { %752 = vmatmul.mubr.f32.gmra.mrb[26].mxu0 %v99_v25  ;;  %446 = vmatprep.mubr.f32.mxu1 %v102_v26  ;;  %v163_v25 = vld [vmem:[#allocation4 + $0x3b0] sm:$0xff]  ;;  %v166_v26 = vld [vmem:[#allocation4 + $0x3c8] sm:$0xff] }
  0x9f   :  { %756 = vmatprep.mubr.f32.mxu0 %v104_v27  ;;  %v168_v27 = vld [vmem:[#allocation4 + $0x3d8] sm:$0xff] }
  0xa1   :  { %447 = vmatmul.mubr.f32.gmra.mrb[28].mxu1 %v101_v28  ;;  %v165_v28 = vld [vmem:[#allocation4 + $0x3c0] sm:$0xff] }
  0xa2   :  { %757 = vmatmul.mubr.f32.gmra.mrb[28].mxu0 %v103_v29  ;;  %451 = vmatprep.mubr.f32.mxu1 %v106_v30  ;;  %v167_v29 = vld [vmem:[#allocation4 + $0x3d0] sm:$0xff]  ;;  %v170_v30 = vld [vmem:[#allocation4 + $0x3e8] sm:$0xff] }
  0xa3   :  { %761 = vmatprep.mubr.f32.mxu0 %v108_v31  ;;  %v172_v31 = vld [vmem:[#allocation4 + $0x3f8] sm:$0xff] }
  0xa5   :  { %452 = vmatmul.mubr.f32.gmra.mrb[30].mxu1 %v105_v32  ;;  %v169_v32 = vld [vmem:[#allocation4 + $0x3e0] sm:$0xff] }
  0xa6   :  { %762 = vmatmul.mubr.f32.gmra.mrb[30].mxu0 %v107_v33  ;;  %456 = vmatprep.mubr.f32.mxu1 %v110_v34  ;;  %v171_v33 = vld [vmem:[#allocation4 + $0x3f0] sm:$0xff]  ;;  %v174_v34 = vld [vmem:[#allocation4 + $0x408] sm:$0xff] }
  0xa7   :  { %766 = vmatprep.mubr.f32.mxu0 %v112_v35  ;;  %v176_v35 = vld [vmem:[#allocation4 + $0x418] sm:$0xff] }
  0xa9   :  { %457 = vmatmul.mubr.f32.gmra.mrb[32].mxu1 %v109_v36  ;;  %v173_v36 = vld [vmem:[#allocation4 + $0x400] sm:$0xff] }
  0xaa   :  { %767 = vmatmul.mubr.f32.gmra.mrb[32].mxu0 %v111_v37  ;;  %461 = vmatprep.mubr.f32.mxu1 %v114_v38  ;;  %v175_v37 = vld [vmem:[#allocation4 + $0x410] sm:$0xff]  ;;  %v178_v38 = vld [vmem:[#allocation4 + $0x428] sm:$0xff] }
  0xab   :  { %771 = vmatprep.mubr.f32.mxu0 %v116_v39  ;;  %v180_v39 = vld [vmem:[#allocation4 + $0x438] sm:$0xff] }
  0xad   :  { %462 = vmatmul.mubr.f32.gmra.mrb[34].mxu1 %v113_v40  ;;  %v177_v40 = vld [vmem:[#allocation4 + $0x420] sm:$0xff] }
  0xae   :  { %772 = vmatmul.mubr.f32.gmra.mrb[34].mxu0 %v115_v41  ;;  %466 = vmatprep.mubr.f32.mxu1 %v118_v42  ;;  %v179_v41 = vld [vmem:[#allocation4 + $0x430] sm:$0xff]  ;;  %v182_v42 = vld [vmem:[#allocation4 + $0x448] sm:$0xff] }
  0xaf   :  { %776 = vmatprep.mubr.f32.mxu0 %v120_v43  ;;  %v184_v43 = vld [vmem:[#allocation4 + $0x458] sm:$0xff] }
  0xb1   :  { %467 = vmatmul.mubr.f32.gmra.mrb[36].mxu1 %v117_v44  ;;  %v181_v44 = vld [vmem:[#allocation4 + $0x440] sm:$0xff] }
  0xb2   :  { %777 = vmatmul.mubr.f32.gmra.mrb[36].mxu0 %v119_v0  ;;  %471 = vmatprep.mubr.f32.mxu1 %v122_v45  ;;  %v183_v0 = vld [vmem:[#allocation4 + $0x450] sm:$0xff]  ;;  %v186_v45 = vld [vmem:[#allocation4 + $0x468] sm:$0xff] }
  0xb3   :  { %781 = vmatprep.mubr.f32.mxu0 %v124_v46  ;;  %v188_v46 = vld [vmem:[#allocation4 + $0x478] sm:$0xff] }
  0xb5   :  { %472 = vmatmul.mubr.f32.gmra.mrb[38].mxu1 %v121_v47  ;;  %v185_v47 = vld [vmem:[#allocation4 + $0x460] sm:$0xff] }
  0xb6   :  { %782 = vmatmul.mubr.f32.gmra.mrb[38].mxu0 %v123_v48  ;;  %476 = vmatprep.mubr.f32.mxu1 %v126_v49  ;;  %v187_v48 = vld [vmem:[#allocation4 + $0x470] sm:$0xff]  ;;  %v190_v49 = vld [vmem:[#allocation4 + $0x488] sm:$0xff] }
  0xb7   :  { %786 = vmatprep.mubr.f32.mxu0 %v128_v50  ;;  %v192_v50 = vld [vmem:[#allocation4 + $0x498] sm:$0xff] }
  0xb9   :  { %477 = vmatmul.mubr.f32.gmra.mrb[40].mxu1 %v125_v51  ;;  %v189_v51 = vld [vmem:[#allocation4 + $0x480] sm:$0xff] }
  0xba   :  { %787 = vmatmul.mubr.f32.gmra.mrb[40].mxu0 %v127_v52  ;;  %481 = vmatprep.mubr.f32.mxu1 %v130_v53  ;;  %v191_v52 = vld [vmem:[#allocation4 + $0x490] sm:$0xff]  ;;  %v194_v53 = vld [vmem:[#allocation4 + $0x4a8] sm:$0xff] }
  0xbb   :  { %791 = vmatprep.mubr.f32.mxu0 %v132_v54  ;;  %v196_v54 = vld [vmem:[#allocation4 + $0x4b8] sm:$0xff] }
  0xbd   :  { %482 = vmatmul.mubr.f32.gmra.mrb[42].mxu1 %v129_v55  ;;  %v193_v55 = vld [vmem:[#allocation4 + $0x4a0] sm:$0xff] }
  0xbe   :  { %792 = vmatmul.mubr.f32.gmra.mrb[42].mxu0 %v131_v56  ;;  %486 = vmatprep.mubr.f32.mxu1 %v134_v57  ;;  %v195_v56 = vld [vmem:[#allocation4 + $0x4b0] sm:$0xff]  ;;  %v198_v57 = vld [vmem:[#allocation4 + $0x4c8] sm:$0xff] }
  0xbf   :  { %796 = vmatprep.mubr.f32.mxu0 %v136_v58  ;;  %v200_v58 = vld [vmem:[#allocation4 + $0x4d8] sm:$0xff] }
  0xc1   :  { %487 = vmatmul.mubr.f32.gmra.mrb[44].mxu1 %v133_v59  ;;  %v197_v59 = vld [vmem:[#allocation4 + $0x4c0] sm:$0xff] }
  0xc2   :  { %797 = vmatmul.mubr.f32.gmra.mrb[44].mxu0 %v135_v60  ;;  %491 = vmatprep.mubr.f32.mxu1 %v138_v61  ;;  %v199_v60 = vld [vmem:[#allocation4 + $0x4d0] sm:$0xff]  ;;  %v202_v61 = vld [vmem:[#allocation4 + $0x4e8] sm:$0xff] }
  0xc3   :  { %801 = vmatprep.mubr.f32.mxu0 %v140_v62  ;;  %v204_v62 = vld [vmem:[#allocation4 + $0x4f8] sm:$0xff] }
  0xc5   :  { %492 = vmatmul.mubr.f32.gmra.mrb[46].mxu1 %v137_v63  ;;  %v201_v63 = vld [vmem:[#allocation4 + $0x4e0] sm:$0xff] }
  0xc6   :  { %802 = vmatmul.mubr.f32.gmra.mrb[46].mxu0 %v139_v1  ;;  %496 = vmatprep.mubr.f32.mxu1 %v142_v2  ;;  %v203_v1 = vld [vmem:[#allocation4 + $0x4f0] sm:$0xff]  ;;  %v206_v2 = vld [vmem:[#allocation4 + $0x508] sm:$0xff] }
  0xc7   :  { %806 = vmatprep.mubr.f32.mxu0 %v144_v3  ;;  %v208_v3 = vld [vmem:[#allocation4 + $0x518] sm:$0xff] }
  0xc9   :  { %497 = vmatmul.mubr.f32.gmra.mrb[48].mxu1 %v141_v4  ;;  %v205_v4 = vld [vmem:[#allocation4 + $0x500] sm:$0xff] }
  0xca   :  { %807 = vmatmul.mubr.f32.gmra.mrb[48].mxu0 %v143_v5  ;;  %501 = vmatprep.mubr.f32.mxu1 %v146_v6  ;;  %v207_v5 = vld [vmem:[#allocation4 + $0x510] sm:$0xff]  ;;  %v210_v6 = vld [vmem:[#allocation4 + $0x528] sm:$0xff] }
  0xcb   :  { %811 = vmatprep.mubr.f32.mxu0 %v148_v7  ;;  %v212_v7 = vld [vmem:[#allocation4 + $0x538] sm:$0xff] }
  0xcd   :  { %502 = vmatmul.mubr.f32.gmra.mrb[50].mxu1 %v145_v8  ;;  %v209_v8 = vld [vmem:[#allocation4 + $0x520] sm:$0xff] }
  0xce   :  { %812 = vmatmul.mubr.f32.gmra.mrb[50].mxu0 %v147_v9  ;;  %506 = vmatprep.mubr.f32.mxu1 %v150_v10  ;;  %v211_v9 = vld [vmem:[#allocation4 + $0x530] sm:$0xff]  ;;  %v214_v10 = vld [vmem:[#allocation4 + $0x548] sm:$0xff] }
  0xcf   :  { %816 = vmatprep.mubr.f32.mxu0 %v152_v11  ;;  %v216_v11 = vld [vmem:[#allocation4 + $0x558] sm:$0xff] }
  0xd1   :  { %507 = vmatmul.mubr.f32.gmra.mrb[52].mxu1 %v149_v12  ;;  %v213_v12 = vld [vmem:[#allocation4 + $0x540] sm:$0xff] }
  0xd2   :  { %817 = vmatmul.mubr.f32.gmra.mrb[52].mxu0 %v151_v13  ;;  %511 = vmatprep.mubr.f32.mxu1 %v154_v14  ;;  %v215_v13 = vld [vmem:[#allocation4 + $0x550] sm:$0xff]  ;;  %v218_v14 = vld [vmem:[#allocation4 + $0x568] sm:$0xff] }
  0xd3   :  { %821 = vmatprep.mubr.f32.mxu0 %v156_v15  ;;  %v220_v15 = vld [vmem:[#allocation4 + $0x578] sm:$0xff] }
  0xd5   :  { %512 = vmatmul.mubr.f32.gmra.mrb[54].mxu1 %v153_v16  ;;  %v217_v16 = vld [vmem:[#allocation4 + $0x560] sm:$0xff] }
  0xd6   :  { %822 = vmatmul.mubr.f32.gmra.mrb[54].mxu0 %v155_v17  ;;  %516 = vmatprep.mubr.f32.mxu1 %v158_v18  ;;  %v219_v17 = vld [vmem:[#allocation4 + $0x570] sm:$0xff]  ;;  %v222_v18 = vld [vmem:[#allocation4 + $0x588] sm:$0xff] }
  0xd7   :  { %826 = vmatprep.mubr.f32.mxu0 %v160_v19  ;;  %v224_v19 = vld [vmem:[#allocation4 + $0x598] sm:$0xff] }
  0xd9   :  { %517 = vmatmul.mubr.f32.gmra.mrb[56].mxu1 %v157_v20  ;;  %v221_v20 = vld [vmem:[#allocation4 + $0x580] sm:$0xff] }
  0xda   :  { %827 = vmatmul.mubr.f32.gmra.mrb[56].mxu0 %v159_v21  ;;  %521 = vmatprep.mubr.f32.mxu1 %v162_v22  ;;  %v223_v21 = vld [vmem:[#allocation4 + $0x590] sm:$0xff]  ;;  %v226_v22 = vld [vmem:[#allocation4 + $0x5a8] sm:$0xff] }
  0xdb   :  { %831 = vmatprep.mubr.f32.mxu0 %v164_v23  ;;  %v228_v23 = vld [vmem:[#allocation4 + $0x5b8] sm:$0xff] }
  0xdd   :  { %522 = vmatmul.mubr.f32.gmra.mrb[58].mxu1 %v161_v24  ;;  %v225_v24 = vld [vmem:[#allocation4 + $0x5a0] sm:$0xff] }
  0xde   :  { %832 = vmatmul.mubr.f32.gmra.mrb[58].mxu0 %v163_v25  ;;  %526 = vmatprep.mubr.f32.mxu1 %v166_v26  ;;  %v227_v25 = vld [vmem:[#allocation4 + $0x5b0] sm:$0xff]  ;;  %v230_v26 = vld [vmem:[#allocation4 + $0x5c8] sm:$0xff] }
  0xdf   :  { %836 = vmatprep.mubr.f32.mxu0 %v168_v27  ;;  %v232_v27 = vld [vmem:[#allocation4 + $0x5d8] sm:$0xff] }
  0xe1   :  { %527 = vmatmul.mubr.f32.gmra.mrb[60].mxu1 %v165_v28  ;;  %v229_v28 = vld [vmem:[#allocation4 + $0x5c0] sm:$0xff] }
  0xe2   :  { %837 = vmatmul.mubr.f32.gmra.mrb[60].mxu0 %v167_v29  ;;  %531 = vmatprep.mubr.f32.mxu1 %v170_v30  ;;  %v231_v29 = vld [vmem:[#allocation4 + $0x5d0] sm:$0xff]  ;;  %v234_v30 = vld [vmem:[#allocation4 + $0x5e8] sm:$0xff] }
  0xe3   :  { %841 = vmatprep.mubr.f32.mxu0 %v172_v31  ;;  %v236_v31 = vld [vmem:[#allocation4 + $0x5f8] sm:$0xff] }
  0xe5   :  { %532 = vmatmul.mubr.f32.gmra.mrb[62].mxu1 %v169_v32  ;;  %v233_v32 = vld [vmem:[#allocation4 + $0x5e0] sm:$0xff] }
  0xe6   :  { %842 = vmatmul.mubr.f32.gmra.mrb[62].mxu0 %v171_v33  ;;  %536 = vmatprep.mubr.f32.mxu1 %v174_v34  ;;  %v235_v33 = vld [vmem:[#allocation4 + $0x5f0] sm:$0xff]  ;;  %v238_v34 = vld [vmem:[#allocation4 + $0x608] sm:$0xff] }
  0xe7   :  { %846 = vmatprep.mubr.f32.mxu0 %v176_v35  ;;  %v240_v35 = vld [vmem:[#allocation4 + $0x618] sm:$0xff] }
  0xe9   :  { %537 = vmatmul.mubr.f32.gmra.mrb[64].mxu1 %v173_v36  ;;  %v237_v36 = vld [vmem:[#allocation4 + $0x600] sm:$0xff] }
  0xea   :  { %847 = vmatmul.mubr.f32.gmra.mrb[64].mxu0 %v175_v37  ;;  %541 = vmatprep.mubr.f32.mxu1 %v178_v38  ;;  %v239_v37 = vld [vmem:[#allocation4 + $0x610] sm:$0xff]  ;;  %v1516_v38 = vld [vmem:[%s1585_s3] ss:$0 sm:$0xff]  ;;  %s1428_s3 = smov [#allocation9]  }
  0xeb   :  { %851 = vmatprep.mubr.f32.mxu0 %v180_v39  ;;  %s1035_s16 = sshll.u32 %s1428_s3, 4  ;;  %s1036_s16 = int_to_ptr.vmem [resolvable:$true] %s1035_s16 }
  0xec   :  { %s1393_s17 = scalar_lea.vmem %s1036_s16, 6272  ;;  %p1398_p3 = scmp.lt.s32.totalorder %s1036_s16, %s1036_s16 }
  0xed   :  { %542 = vmatmul.mubr.f32.gmra.mrb[66].mxu1 %v177_v40  ;;  %p1394_p2 = scmp.ne.s32.totalorder %s1036_s16, %s1393_s17  ;;  %p1399_p4 = scmp.lt.s32.totalorder %s1393_s17, %s1393_s17 }
  0xee   :  { %852 = vmatmul.mubr.f32.gmra.mrb[66].mxu0 %v179_v41  ;;  %546 = vmatprep.mubr.f32.mxu1 %v182_v42 }
  0xef   :  { %856 = vmatprep.mubr.f32.mxu0 %v184_v43  ;;  %p1400_p5 = por %p1399_p4, %p1398_p3 }
  0xf1   :  { %547 = vmatmul.mubr.f32.gmra.mrb[68].mxu1 %v181_v44  ;;  %p1401_p6 = pnand %p1400_p5, %p1394_p2 }
  0xf2   :  { %857 = vmatmul.mubr.f32.gmra.mrb[68].mxu0 %v183_v0  ;;  %551 = vmatprep.mubr.f32.mxu1 %v186_v45 }
  0xf3   :  { %861 = vmatprep.mubr.f32.mxu0 %v188_v46 }
  0xf5   :  { %552 = vmatmul.mubr.f32.gmra.mrb[70].mxu1 %v185_v47 }
  0xf6   :  { %862 = vmatmul.mubr.f32.gmra.mrb[70].mxu0 %v187_v48  ;;  %556 = vmatprep.mubr.f32.mxu1 %v190_v49 }
  0xf7   :  { %866 = vmatprep.mubr.f32.mxu0 %v192_v50 }
  0xf9   :  { %557 = vmatmul.mubr.f32.gmra.mrb[72].mxu1 %v189_v51 }
  0xfa   :  { %867 = vmatmul.mubr.f32.gmra.mrb[72].mxu0 %v191_v52  ;;  %561 = vmatprep.mubr.f32.mxu1 %v194_v53 }
  0xfb   :  { %871 = vmatprep.mubr.f32.mxu0 %v196_v54 }
  0xfd   :  { %562 = vmatmul.mubr.f32.gmra.mrb[74].mxu1 %v193_v55 }
  0xfe   :  { %872 = vmatmul.mubr.f32.gmra.mrb[74].mxu0 %v195_v56  ;;  %566 = vmatprep.mubr.f32.mxu1 %v198_v57 }
  0xff   :  { %876 = vmatprep.mubr.f32.mxu0 %v200_v58 }
 0x101   :  { %567 = vmatmul.mubr.f32.gmra.mrb[76].mxu1 %v197_v59 }
 0x102   :  { %877 = vmatmul.mubr.f32.gmra.mrb[76].mxu0 %v199_v60  ;;  %571 = vmatprep.mubr.f32.mxu1 %v202_v61 }
 0x103   :  { %881 = vmatprep.mubr.f32.mxu0 %v204_v62 }
 0x105   :  { %572 = vmatmul.mubr.f32.gmra.mrb[78].mxu1 %v201_v63 }
 0x106   :  { %882 = vmatmul.mubr.f32.gmra.mrb[78].mxu0 %v203_v1  ;;  %576 = vmatprep.mubr.f32.mxu1 %v206_v2 }
 0x107   :  { %886 = vmatprep.mubr.f32.mxu0 %v208_v3 }
 0x109   :  { %577 = vmatmul.mubr.f32.gmra.mrb[80].mxu1 %v205_v4 }
 0x10a   :  { %887 = vmatmul.mubr.f32.gmra.mrb[80].mxu0 %v207_v5  ;;  %581 = vmatprep.mubr.f32.mxu1 %v210_v6 }
 0x10b   :  { %891 = vmatprep.mubr.f32.mxu0 %v212_v7 }
 0x10d   :  { %582 = vmatmul.mubr.f32.gmra.mrb[82].mxu1 %v209_v8 }
 0x10e   :  { %892 = vmatmul.mubr.f32.gmra.mrb[82].mxu0 %v211_v9  ;;  %586 = vmatprep.mubr.f32.mxu1 %v214_v10 }
 0x10f   :  { %896 = vmatprep.mubr.f32.mxu0 %v216_v11 }
 0x111   :  { %587 = vmatmul.mubr.f32.gmra.mrb[84].mxu1 %v213_v12 }
 0x112   :  { %897 = vmatmul.mubr.f32.gmra.mrb[84].mxu0 %v215_v13  ;;  %591 = vmatprep.mubr.f32.mxu1 %v218_v14 }
 0x113   :  { %901 = vmatprep.mubr.f32.mxu0 %v220_v15 }
 0x115   :  { %592 = vmatmul.mubr.f32.gmra.mrb[86].mxu1 %v217_v16 }
 0x116   :  { %902 = vmatmul.mubr.f32.gmra.mrb[86].mxu0 %v219_v17  ;;  %596 = vmatprep.mubr.f32.mxu1 %v222_v18 }
 0x117   :  { %906 = vmatprep.mubr.f32.mxu0 %v224_v19 }
 0x119   :  { %597 = vmatmul.mubr.f32.gmra.mrb[88].mxu1 %v221_v20 }
 0x11a   :  { %907 = vmatmul.mubr.f32.gmra.mrb[88].mxu0 %v223_v21  ;;  %601 = vmatprep.mubr.f32.mxu1 %v226_v22 }
 0x11b   :  { %911 = vmatprep.mubr.f32.mxu0 %v228_v23 }
 0x11d   :  { %602 = vmatmul.mubr.f32.gmra.mrb[90].mxu1 %v225_v24 }
 0x11e   :  { %912 = vmatmul.mubr.f32.gmra.mrb[90].mxu0 %v227_v25  ;;  %606 = vmatprep.mubr.f32.mxu1 %v230_v26 }
 0x11f   :  { %916 = vmatprep.mubr.f32.mxu0 %v232_v27 }
 0x121   :  { %607 = vmatmul.mubr.f32.gmra.mrb[92].mxu1 %v229_v28 }
 0x122   :  { %917 = vmatmul.mubr.f32.gmra.mrb[92].mxu0 %v231_v29  ;;  %611 = vmatprep.mubr.f32.mxu1 %v234_v30 }
 0x123   :  { %921 = vmatprep.mubr.f32.mxu0 %v236_v31 }
 0x125   :  { %612 = vmatmul.mubr.f32.gmra.mrb[94].mxu1 %v233_v32 }
 0x126   :  { %922 = vmatmul.mubr.f32.gmra.mrb[94].mxu0 %v235_v33  ;;  %616 = vmatprep.mubr.f32.mxu1 %v238_v34 }
 0x127   :  { %926 = vmatprep.mubr.f32.mxu0 %v240_v35 }
 0x129   :  { %617 = vmatmul.mubr.f32.gmra.mrb[96].mxu1 %v237_v36 }
 0x12a   :  { %927 = vmatmul.mubr.f32.gmra.mrb[96].mxu0 %v239_v37 }
 0x13c   :  { %v378_v39 = vpop.f32.mrb[0].mxu1 }
 0x13d   :  { %v379_v40 = vadd.f32 %v1516_v38, %v378_v39  ;;  %v380_v41 = vpop.f32.mrb[1].mxu1  ;;  %v688_v42 = vpop.f32.mrb[0].mxu0 }
 0x13e   :  { %v690_v43 = vpop.f32.mrb[1].mxu0 }
 0x13f   :  { %v689_v44 = vadd.f32 %v688_v42, %v379_v40 }
 0x140   :  { %v383_v0 = vpop.f32.mrb[2].mxu1 }
 0x141   :  { %1251 = vtanh.f32 %v689_v44  ;;  %v384_v45 = vadd.f32 %v1516_v38, %v383_v0  ;;  %v385_v46 = vpop.f32.mrb[3].mxu1  ;;  %v693_v47 = vpop.f32.mrb[2].mxu0 }
 0x142   :  { %v695_v48 = vpop.f32.mrb[3].mxu0 }
 0x143   :  { %v694_v49 = vadd.f32 %v693_v47, %v384_v45 }
 0x144   :  { %v388_v50 = vpop.f32.mrb[4].mxu1 }
 0x145   :  { %1253 = vtanh.f32 %v694_v49  ;;  %v389_v51 = vadd.f32 %v1516_v38, %v388_v50  ;;  %v390_v52 = vpop.f32.mrb[5].mxu1  ;;  %v698_v53 = vpop.f32.mrb[4].mxu0 }
 0x146   :  { %v700_v54 = vpop.f32.mrb[5].mxu0 }
 0x147   :  { %v699_v55 = vadd.f32 %v698_v53, %v389_v51 }
 0x148   :  { %v393_v56 = vpop.f32.mrb[6].mxu1 }
 0x149   :  { %1255 = vtanh.f32 %v699_v55  ;;  %v394_v57 = vadd.f32 %v1516_v38, %v393_v56  ;;  %v395_v58 = vpop.f32.mrb[7].mxu1  ;;  %v703_v59 = vpop.f32.mrb[6].mxu0 }
 0x14a   :  { %v705_v60 = vpop.f32.mrb[7].mxu0 }
 0x14b   :  { %v1252_v61 = vpop.eup %1251  ;;  %v704_v62 = vadd.f32 %v703_v59, %v394_v57 }
 0x14c   :  { %981 = vst [vmem:[#allocation9] sm:$0xff] %v1252_v61  ;;  %v398_v63 = vpop.f32.mrb[8].mxu1 }
 0x14d   :  { %1257 = vtanh.f32 %v704_v62  ;;  %v399_v1 = vadd.f32 %v1516_v38, %v398_v63  ;;  %v400_v2 = vpop.f32.mrb[9].mxu1  ;;  %v708_v3 = vpop.f32.mrb[8].mxu0 }
 0x14e   :  { %v710_v4 = vpop.f32.mrb[9].mxu0 }
 0x14f   :  { %v1254_v5 = vpop.eup %1253  ;;  %v709_v6 = vadd.f32 %v708_v3, %v399_v1 }
 0x150   :  { %982 = vst [vmem:[#allocation9 + $0x8] sm:$0xff] %v1254_v5  ;;  %v403_v7 = vpop.f32.mrb[10].mxu1 }
 0x151   :  { %1259 = vtanh.f32 %v709_v6  ;;  %v404_v8 = vadd.f32 %v1516_v38, %v403_v7  ;;  %v405_v9 = vpop.f32.mrb[11].mxu1  ;;  %v713_v10 = vpop.f32.mrb[10].mxu0 }
 0x152   :  { %v715_v11 = vpop.f32.mrb[11].mxu0 }
 0x153   :  { %v1256_v12 = vpop.eup %1255  ;;  %v714_v13 = vadd.f32 %v713_v10, %v404_v8 }
 0x154   :  { %983 = vst [vmem:[#allocation9 + $0x10] sm:$0xff] %v1256_v12  ;;  %v408_v14 = vpop.f32.mrb[12].mxu1 }
 0x155   :  { %1261 = vtanh.f32 %v714_v13  ;;  %v409_v15 = vadd.f32 %v1516_v38, %v408_v14  ;;  %v410_v16 = vpop.f32.mrb[13].mxu1  ;;  %v718_v17 = vpop.f32.mrb[12].mxu0 }
 0x156   :  { %v720_v18 = vpop.f32.mrb[13].mxu0 }
 0x157   :  { %v1258_v19 = vpop.eup %1257  ;;  %v719_v20 = vadd.f32 %v718_v17, %v409_v15 }
 0x158   :  { %984 = vst [vmem:[#allocation9 + $0x18] sm:$0xff] %v1258_v19  ;;  %v413_v21 = vpop.f32.mrb[14].mxu1 }
 0x159   :  { %1263 = vtanh.f32 %v719_v20  ;;  %v414_v22 = vadd.f32 %v1516_v38, %v413_v21  ;;  %v415_v23 = vpop.f32.mrb[15].mxu1  ;;  %v723_v24 = vpop.f32.mrb[14].mxu0 }
 0x15a   :  { %v725_v25 = vpop.f32.mrb[15].mxu0 }
 0x15b   :  { %v1260_v26 = vpop.eup %1259  ;;  %v724_v27 = vadd.f32 %v723_v24, %v414_v22 }
 0x15c   :  { %985 = vst [vmem:[#allocation9 + $0x20] sm:$0xff] %v1260_v26  ;;  %v418_v28 = vpop.f32.mrb[16].mxu1 }
 0x15d   :  { %1265 = vtanh.f32 %v724_v27  ;;  %v419_v29 = vadd.f32 %v1516_v38, %v418_v28  ;;  %v420_v30 = vpop.f32.mrb[17].mxu1  ;;  %v728_v31 = vpop.f32.mrb[16].mxu0 }
 0x15e   :  { %v730_v32 = vpop.f32.mrb[17].mxu0 }
 0x15f   :  { %v1262_v33 = vpop.eup %1261  ;;  %v729_v34 = vadd.f32 %v728_v31, %v419_v29 }
 0x160   :  { %986 = vst [vmem:[#allocation9 + $0x28] sm:$0xff] %v1262_v33  ;;  %v423_v35 = vpop.f32.mrb[18].mxu1 }
 0x161   :  { %1267 = vtanh.f32 %v729_v34  ;;  %v424_v36 = vadd.f32 %v1516_v38, %v423_v35  ;;  %v425_v37 = vpop.f32.mrb[19].mxu1  ;;  %v733_v39 = vpop.f32.mrb[18].mxu0 }
 0x162   :  { %v735_v40 = vpop.f32.mrb[19].mxu0 }
 0x163   :  { %v1264_v41 = vpop.eup %1263  ;;  %v734_v42 = vadd.f32 %v733_v39, %v424_v36 }
 0x164   :  { %987 = vst [vmem:[#allocation9 + $0x30] sm:$0xff] %v1264_v41  ;;  %v428_v43 = vpop.f32.mrb[20].mxu1 }
 0x165   :  { %1269 = vtanh.f32 %v734_v42  ;;  %v429_v44 = vadd.f32 %v1516_v38, %v428_v43  ;;  %v430_v0 = vpop.f32.mrb[21].mxu1  ;;  %v738_v45 = vpop.f32.mrb[20].mxu0 }
 0x166   :  { %v740_v46 = vpop.f32.mrb[21].mxu0 }
 0x167   :  { %v1266_v47 = vpop.eup %1265  ;;  %v739_v48 = vadd.f32 %v738_v45, %v429_v44 }
 0x168   :  { %988 = vst [vmem:[#allocation9 + $0x38] sm:$0xff] %v1266_v47  ;;  %v433_v49 = vpop.f32.mrb[22].mxu1 }
 0x169   :  { %1271 = vtanh.f32 %v739_v48  ;;  %v434_v50 = vadd.f32 %v1516_v38, %v433_v49  ;;  %v435_v51 = vpop.f32.mrb[23].mxu1  ;;  %v743_v52 = vpop.f32.mrb[22].mxu0 }
 0x16a   :  { %v745_v53 = vpop.f32.mrb[23].mxu0 }
 0x16b   :  { %v1268_v54 = vpop.eup %1267  ;;  %v744_v55 = vadd.f32 %v743_v52, %v434_v50 }
 0x16c   :  { %989 = vst [vmem:[#allocation9 + $0x40] sm:$0xff] %v1268_v54  ;;  %v438_v56 = vpop.f32.mrb[24].mxu1 }
 0x16d   :  { %1273 = vtanh.f32 %v744_v55  ;;  %v439_v57 = vadd.f32 %v1516_v38, %v438_v56  ;;  %v440_v58 = vpop.f32.mrb[25].mxu1  ;;  %v748_v59 = vpop.f32.mrb[24].mxu0 }
 0x16e   :  { %v750_v60 = vpop.f32.mrb[25].mxu0 }
 0x16f   :  { %v1270_v61 = vpop.eup %1269  ;;  %v749_v62 = vadd.f32 %v748_v59, %v439_v57 }
 0x170   :  { %990 = vst [vmem:[#allocation9 + $0x48] sm:$0xff] %v1270_v61  ;;  %v443_v63 = vpop.f32.mrb[26].mxu1 }
 0x171   :  { %1275 = vtanh.f32 %v749_v62  ;;  %v444_v1 = vadd.f32 %v1516_v38, %v443_v63  ;;  %v445_v2 = vpop.f32.mrb[27].mxu1  ;;  %v753_v3 = vpop.f32.mrb[26].mxu0 }
 0x172   :  { %v755_v4 = vpop.f32.mrb[27].mxu0 }
 0x173   :  { %v1272_v5 = vpop.eup %1271  ;;  %v754_v6 = vadd.f32 %v753_v3, %v444_v1 }
 0x174   :  { %991 = vst [vmem:[#allocation9 + $0x50] sm:$0xff] %v1272_v5  ;;  %v448_v7 = vpop.f32.mrb[28].mxu1 }
 0x175   :  { %1277 = vtanh.f32 %v754_v6  ;;  %v449_v8 = vadd.f32 %v1516_v38, %v448_v7  ;;  %v450_v9 = vpop.f32.mrb[29].mxu1  ;;  %v758_v10 = vpop.f32.mrb[28].mxu0 }
 0x176   :  { %v760_v11 = vpop.f32.mrb[29].mxu0 }
 0x177   :  { %v1274_v12 = vpop.eup %1273  ;;  %v759_v13 = vadd.f32 %v758_v10, %v449_v8 }
 0x178   :  { %992 = vst [vmem:[#allocation9 + $0x58] sm:$0xff] %v1274_v12  ;;  %v453_v14 = vpop.f32.mrb[30].mxu1 }
 0x179   :  { %1279 = vtanh.f32 %v759_v13  ;;  %v454_v15 = vadd.f32 %v1516_v38, %v453_v14  ;;  %v455_v16 = vpop.f32.mrb[31].mxu1  ;;  %v763_v17 = vpop.f32.mrb[30].mxu0 }
 0x17a   :  { %v765_v18 = vpop.f32.mrb[31].mxu0 }
 0x17b   :  { %v1276_v19 = vpop.eup %1275  ;;  %v764_v20 = vadd.f32 %v763_v17, %v454_v15 }
 0x17c   :  { %993 = vst [vmem:[#allocation9 + $0x60] sm:$0xff] %v1276_v19  ;;  %v458_v21 = vpop.f32.mrb[32].mxu1 }
 0x17d   :  { %1281 = vtanh.f32 %v764_v20  ;;  %v459_v22 = vadd.f32 %v1516_v38, %v458_v21  ;;  %v460_v23 = vpop.f32.mrb[33].mxu1  ;;  %v768_v24 = vpop.f32.mrb[32].mxu0 }
 0x17e   :  { %v770_v25 = vpop.f32.mrb[33].mxu0 }
 0x17f   :  { %v1278_v26 = vpop.eup %1277  ;;  %v769_v27 = vadd.f32 %v768_v24, %v459_v22 }
 0x180   :  { %994 = vst [vmem:[#allocation9 + $0x68] sm:$0xff] %v1278_v26  ;;  %v463_v28 = vpop.f32.mrb[34].mxu1 }
 0x181   :  { %1283 = vtanh.f32 %v769_v27  ;;  %v464_v29 = vadd.f32 %v1516_v38, %v463_v28  ;;  %v465_v30 = vpop.f32.mrb[35].mxu1  ;;  %v773_v31 = vpop.f32.mrb[34].mxu0 }
 0x182   :  { %v775_v32 = vpop.f32.mrb[35].mxu0 }
 0x183   :  { %v1280_v33 = vpop.eup %1279  ;;  %v774_v34 = vadd.f32 %v773_v31, %v464_v29 }
 0x184   :  { %995 = vst [vmem:[#allocation9 + $0x70] sm:$0xff] %v1280_v33  ;;  %v468_v35 = vpop.f32.mrb[36].mxu1 }
 0x185   :  { %1285 = vtanh.f32 %v774_v34  ;;  %v469_v36 = vadd.f32 %v1516_v38, %v468_v35  ;;  %v470_v37 = vpop.f32.mrb[37].mxu1  ;;  %v778_v39 = vpop.f32.mrb[36].mxu0 }
 0x186   :  { %v780_v40 = vpop.f32.mrb[37].mxu0 }
 0x187   :  { %v1282_v41 = vpop.eup %1281  ;;  %v779_v42 = vadd.f32 %v778_v39, %v469_v36 }
 0x188   :  { %996 = vst [vmem:[#allocation9 + $0x78] sm:$0xff] %v1282_v41  ;;  %v473_v43 = vpop.f32.mrb[38].mxu1 }
 0x189   :  { %1287 = vtanh.f32 %v779_v42  ;;  %v474_v44 = vadd.f32 %v1516_v38, %v473_v43  ;;  %v475_v0 = vpop.f32.mrb[39].mxu1  ;;  %v783_v45 = vpop.f32.mrb[38].mxu0 }
 0x18a   :  { %v785_v46 = vpop.f32.mrb[39].mxu0 }
 0x18b   :  { %v1284_v47 = vpop.eup %1283  ;;  %v784_v48 = vadd.f32 %v783_v45, %v474_v44 }
 0x18c   :  { %997 = vst [vmem:[#allocation9 + $0x80] sm:$0xff] %v1284_v47  ;;  %v478_v49 = vpop.f32.mrb[40].mxu1 }
 0x18d   :  { %1289 = vtanh.f32 %v784_v48  ;;  %v479_v50 = vadd.f32 %v1516_v38, %v478_v49  ;;  %v480_v51 = vpop.f32.mrb[41].mxu1  ;;  %v788_v52 = vpop.f32.mrb[40].mxu0 }
 0x18e   :  { %v790_v53 = vpop.f32.mrb[41].mxu0 }
 0x18f   :  { %v1286_v54 = vpop.eup %1285  ;;  %v789_v55 = vadd.f32 %v788_v52, %v479_v50 }
 0x190   :  { %998 = vst [vmem:[#allocation9 + $0x88] sm:$0xff] %v1286_v54  ;;  %v483_v56 = vpop.f32.mrb[42].mxu1 }
 0x191   :  { %1291 = vtanh.f32 %v789_v55  ;;  %v484_v57 = vadd.f32 %v1516_v38, %v483_v56  ;;  %v485_v58 = vpop.f32.mrb[43].mxu1  ;;  %v793_v59 = vpop.f32.mrb[42].mxu0 }
 0x192   :  { %v795_v60 = vpop.f32.mrb[43].mxu0 }
 0x193   :  { %v1288_v61 = vpop.eup %1287  ;;  %v794_v62 = vadd.f32 %v793_v59, %v484_v57 }
 0x194   :  { %999 = vst [vmem:[#allocation9 + $0x90] sm:$0xff] %v1288_v61  ;;  %v488_v63 = vpop.f32.mrb[44].mxu1 }
 0x195   :  { %1293 = vtanh.f32 %v794_v62  ;;  %v489_v1 = vadd.f32 %v1516_v38, %v488_v63  ;;  %v490_v2 = vpop.f32.mrb[45].mxu1  ;;  %v798_v3 = vpop.f32.mrb[44].mxu0 }
 0x196   :  { %v800_v4 = vpop.f32.mrb[45].mxu0 }
 0x197   :  { %v1290_v5 = vpop.eup %1289  ;;  %v799_v6 = vadd.f32 %v798_v3, %v489_v1 }
 0x198   :  { %1000 = vst [vmem:[#allocation9 + $0x98] sm:$0xff] %v1290_v5  ;;  %v493_v7 = vpop.f32.mrb[46].mxu1 }
 0x199   :  { %1295 = vtanh.f32 %v799_v6  ;;  %v494_v8 = vadd.f32 %v1516_v38, %v493_v7  ;;  %v495_v9 = vpop.f32.mrb[47].mxu1  ;;  %v803_v10 = vpop.f32.mrb[46].mxu0 }
 0x19a   :  { %v805_v11 = vpop.f32.mrb[47].mxu0 }
 0x19b   :  { %v1292_v12 = vpop.eup %1291  ;;  %v804_v13 = vadd.f32 %v803_v10, %v494_v8 }
 0x19c   :  { %1001 = vst [vmem:[#allocation9 + $0xa0] sm:$0xff] %v1292_v12  ;;  %v498_v14 = vpop.f32.mrb[48].mxu1 }
 0x19d   :  { %1297 = vtanh.f32 %v804_v13  ;;  %v499_v15 = vadd.f32 %v1516_v38, %v498_v14  ;;  %v500_v16 = vpop.f32.mrb[49].mxu1  ;;  %v808_v17 = vpop.f32.mrb[48].mxu0 }
 0x19e   :  { %v810_v18 = vpop.f32.mrb[49].mxu0 }
 0x19f   :  { %v1294_v19 = vpop.eup %1293  ;;  %v809_v20 = vadd.f32 %v808_v17, %v499_v15 }
 0x1a0   :  { %1002 = vst [vmem:[#allocation9 + $0xa8] sm:$0xff] %v1294_v19  ;;  %v503_v21 = vpop.f32.mrb[50].mxu1 }
 0x1a1   :  { %1299 = vtanh.f32 %v809_v20  ;;  %v504_v22 = vadd.f32 %v1516_v38, %v503_v21  ;;  %v505_v23 = vpop.f32.mrb[51].mxu1  ;;  %v813_v24 = vpop.f32.mrb[50].mxu0 }
 0x1a2   :  { %v815_v25 = vpop.f32.mrb[51].mxu0 }
 0x1a3   :  { %v1296_v26 = vpop.eup %1295  ;;  %v814_v27 = vadd.f32 %v813_v24, %v504_v22 }
 0x1a4   :  { %1003 = vst [vmem:[#allocation9 + $0xb0] sm:$0xff] %v1296_v26  ;;  %v508_v28 = vpop.f32.mrb[52].mxu1 }
 0x1a5   :  { %1301 = vtanh.f32 %v814_v27  ;;  %v509_v29 = vadd.f32 %v1516_v38, %v508_v28  ;;  %v510_v30 = vpop.f32.mrb[53].mxu1  ;;  %v818_v31 = vpop.f32.mrb[52].mxu0 }
 0x1a6   :  { %v820_v32 = vpop.f32.mrb[53].mxu0 }
 0x1a7   :  { %v1298_v33 = vpop.eup %1297  ;;  %v819_v34 = vadd.f32 %v818_v31, %v509_v29 }
 0x1a8   :  { %1004 = vst [vmem:[#allocation9 + $0xb8] sm:$0xff] %v1298_v33  ;;  %v513_v35 = vpop.f32.mrb[54].mxu1 }
 0x1a9   :  { %1303 = vtanh.f32 %v819_v34  ;;  %v514_v36 = vadd.f32 %v1516_v38, %v513_v35  ;;  %v515_v37 = vpop.f32.mrb[55].mxu1  ;;  %v823_v39 = vpop.f32.mrb[54].mxu0 }
 0x1aa   :  { %v825_v40 = vpop.f32.mrb[55].mxu0 }
 0x1ab   :  { %v1300_v41 = vpop.eup %1299  ;;  %v824_v42 = vadd.f32 %v823_v39, %v514_v36 }
 0x1ac   :  { %1005 = vst [vmem:[#allocation9 + $0xc0] sm:$0xff] %v1300_v41  ;;  %v518_v43 = vpop.f32.mrb[56].mxu1 }
 0x1ad   :  { %1305 = vtanh.f32 %v824_v42  ;;  %v519_v44 = vadd.f32 %v1516_v38, %v518_v43  ;;  %v520_v0 = vpop.f32.mrb[57].mxu1  ;;  %v828_v45 = vpop.f32.mrb[56].mxu0 }
 0x1ae   :  { %v830_v46 = vpop.f32.mrb[57].mxu0 }
 0x1af   :  { %v1302_v47 = vpop.eup %1301  ;;  %v829_v48 = vadd.f32 %v828_v45, %v519_v44 }
 0x1b0   :  { %1006 = vst [vmem:[#allocation9 + $0xc8] sm:$0xff] %v1302_v47  ;;  %v523_v49 = vpop.f32.mrb[58].mxu1 }
 0x1b1   :  { %1307 = vtanh.f32 %v829_v48  ;;  %v524_v50 = vadd.f32 %v1516_v38, %v523_v49  ;;  %v525_v51 = vpop.f32.mrb[59].mxu1  ;;  %v833_v52 = vpop.f32.mrb[58].mxu0 }
 0x1b2   :  { %v835_v53 = vpop.f32.mrb[59].mxu0 }
 0x1b3   :  { %v1304_v54 = vpop.eup %1303  ;;  %v834_v55 = vadd.f32 %v833_v52, %v524_v50 }
 0x1b4   :  { %1007 = vst [vmem:[#allocation9 + $0xd0] sm:$0xff] %v1304_v54  ;;  %v528_v56 = vpop.f32.mrb[60].mxu1 }
 0x1b5   :  { %1309 = vtanh.f32 %v834_v55  ;;  %v529_v57 = vadd.f32 %v1516_v38, %v528_v56  ;;  %v530_v58 = vpop.f32.mrb[61].mxu1  ;;  %v838_v59 = vpop.f32.mrb[60].mxu0 }
 0x1b6   :  { %v840_v60 = vpop.f32.mrb[61].mxu0 }
 0x1b7   :  { %v1306_v61 = vpop.eup %1305  ;;  %v839_v62 = vadd.f32 %v838_v59, %v529_v57 }
 0x1b8   :  { %1008 = vst [vmem:[#allocation9 + $0xd8] sm:$0xff] %v1306_v61  ;;  %v533_v63 = vpop.f32.mrb[62].mxu1 }
 0x1b9   :  { %1311 = vtanh.f32 %v839_v62  ;;  %v534_v1 = vadd.f32 %v1516_v38, %v533_v63  ;;  %v535_v2 = vpop.f32.mrb[63].mxu1  ;;  %v843_v3 = vpop.f32.mrb[62].mxu0 }
 0x1ba   :  { %v845_v4 = vpop.f32.mrb[63].mxu0 }
 0x1bb   :  { %v1308_v5 = vpop.eup %1307  ;;  %v844_v6 = vadd.f32 %v843_v3, %v534_v1 }
 0x1bc   :  { %1009 = vst [vmem:[#allocation9 + $0xe0] sm:$0xff] %v1308_v5  ;;  %v538_v7 = vpop.f32.mrb[64].mxu1 }
 0x1bd   :  { %1313 = vtanh.f32 %v844_v6  ;;  %v539_v8 = vadd.f32 %v1516_v38, %v538_v7  ;;  %v540_v9 = vpop.f32.mrb[65].mxu1  ;;  %v848_v10 = vpop.f32.mrb[64].mxu0 }
 0x1be   :  { %v850_v11 = vpop.f32.mrb[65].mxu0 }
 0x1bf   :  { %v1310_v12 = vpop.eup %1309  ;;  %v849_v13 = vadd.f32 %v848_v10, %v539_v8 }
 0x1c0   :  { %1010 = vst [vmem:[#allocation9 + $0xe8] sm:$0xff] %v1310_v12  ;;  %v543_v14 = vpop.f32.mrb[66].mxu1 }
 0x1c1   :  { %1315 = vtanh.f32 %v849_v13  ;;  %v544_v15 = vadd.f32 %v1516_v38, %v543_v14  ;;  %v545_v16 = vpop.f32.mrb[67].mxu1  ;;  %v853_v17 = vpop.f32.mrb[66].mxu0 }
 0x1c2   :  { %v855_v18 = vpop.f32.mrb[67].mxu0 }
 0x1c3   :  { %v1312_v19 = vpop.eup %1311  ;;  %v854_v20 = vadd.f32 %v853_v17, %v544_v15 }
 0x1c4   :  { %1011 = vst [vmem:[#allocation9 + $0xf0] sm:$0xff] %v1312_v19  ;;  %v548_v21 = vpop.f32.mrb[68].mxu1 }
 0x1c5   :  { %1317 = vtanh.f32 %v854_v20  ;;  %v549_v22 = vadd.f32 %v1516_v38, %v548_v21  ;;  %v550_v23 = vpop.f32.mrb[69].mxu1  ;;  %v858_v24 = vpop.f32.mrb[68].mxu0 }
 0x1c6   :  { %v860_v25 = vpop.f32.mrb[69].mxu0 }
 0x1c7   :  { %v1314_v26 = vpop.eup %1313  ;;  %v859_v27 = vadd.f32 %v858_v24, %v549_v22 }
 0x1c8   :  { %1012 = vst [vmem:[#allocation9 + $0xf8] sm:$0xff] %v1314_v26  ;;  %v553_v28 = vpop.f32.mrb[70].mxu1 }
 0x1c9   :  { %1319 = vtanh.f32 %v859_v27  ;;  %v554_v29 = vadd.f32 %v1516_v38, %v553_v28  ;;  %v555_v30 = vpop.f32.mrb[71].mxu1  ;;  %v863_v31 = vpop.f32.mrb[70].mxu0 }
 0x1ca   :  { %v865_v32 = vpop.f32.mrb[71].mxu0 }
 0x1cb   :  { %v1316_v33 = vpop.eup %1315  ;;  %v864_v34 = vadd.f32 %v863_v31, %v554_v29 }
 0x1cc   :  { %1013 = vst [vmem:[#allocation9 + $0x100] sm:$0xff] %v1316_v33  ;;  %v558_v35 = vpop.f32.mrb[72].mxu1 }
 0x1cd   :  { %1321 = vtanh.f32 %v864_v34  ;;  %v559_v36 = vadd.f32 %v1516_v38, %v558_v35  ;;  %v560_v37 = vpop.f32.mrb[73].mxu1  ;;  %v868_v39 = vpop.f32.mrb[72].mxu0 }
 0x1ce   :  { %v870_v40 = vpop.f32.mrb[73].mxu0 }
 0x1cf   :  { %v1318_v41 = vpop.eup %1317  ;;  %v869_v42 = vadd.f32 %v868_v39, %v559_v36 }
 0x1d0   :  { %1014 = vst [vmem:[#allocation9 + $0x108] sm:$0xff] %v1318_v41  ;;  %v563_v43 = vpop.f32.mrb[74].mxu1 }
 0x1d1   :  { %1323 = vtanh.f32 %v869_v42  ;;  %v564_v44 = vadd.f32 %v1516_v38, %v563_v43  ;;  %v565_v0 = vpop.f32.mrb[75].mxu1  ;;  %v873_v45 = vpop.f32.mrb[74].mxu0 }
 0x1d2   :  { %v875_v46 = vpop.f32.mrb[75].mxu0 }
 0x1d3   :  { %v1320_v47 = vpop.eup %1319  ;;  %v874_v48 = vadd.f32 %v873_v45, %v564_v44 }
 0x1d4   :  { %1015 = vst [vmem:[#allocation9 + $0x110] sm:$0xff] %v1320_v47  ;;  %v568_v49 = vpop.f32.mrb[76].mxu1 }
 0x1d5   :  { %1325 = vtanh.f32 %v874_v48  ;;  %v569_v50 = vadd.f32 %v1516_v38, %v568_v49  ;;  %v570_v51 = vpop.f32.mrb[77].mxu1  ;;  %v878_v52 = vpop.f32.mrb[76].mxu0 }
 0x1d6   :  { %v880_v53 = vpop.f32.mrb[77].mxu0 }
 0x1d7   :  { %v1322_v54 = vpop.eup %1321  ;;  %v879_v55 = vadd.f32 %v878_v52, %v569_v50 }
 0x1d8   :  { %1016 = vst [vmem:[#allocation9 + $0x118] sm:$0xff] %v1322_v54  ;;  %v573_v56 = vpop.f32.mrb[78].mxu1 }
 0x1d9   :  { %1327 = vtanh.f32 %v879_v55  ;;  %v574_v57 = vadd.f32 %v1516_v38, %v573_v56  ;;  %v575_v58 = vpop.f32.mrb[79].mxu1  ;;  %v883_v59 = vpop.f32.mrb[78].mxu0 }
 0x1da   :  { %v885_v60 = vpop.f32.mrb[79].mxu0 }
 0x1db   :  { %v1324_v61 = vpop.eup %1323  ;;  %v884_v62 = vadd.f32 %v883_v59, %v574_v57 }
 0x1dc   :  { %1017 = vst [vmem:[#allocation9 + $0x120] sm:$0xff] %v1324_v61  ;;  %v578_v63 = vpop.f32.mrb[80].mxu1 }
 0x1dd   :  { %1329 = vtanh.f32 %v884_v62  ;;  %v579_v1 = vadd.f32 %v1516_v38, %v578_v63  ;;  %v580_v2 = vpop.f32.mrb[81].mxu1  ;;  %v888_v3 = vpop.f32.mrb[80].mxu0 }
 0x1de   :  { %v890_v4 = vpop.f32.mrb[81].mxu0 }
 0x1df   :  { %v1326_v5 = vpop.eup %1325  ;;  %v889_v6 = vadd.f32 %v888_v3, %v579_v1 }
 0x1e0   :  { %1018 = vst [vmem:[#allocation9 + $0x128] sm:$0xff] %v1326_v5  ;;  %v583_v7 = vpop.f32.mrb[82].mxu1 }
 0x1e1   :  { %1331 = vtanh.f32 %v889_v6  ;;  %v584_v8 = vadd.f32 %v1516_v38, %v583_v7  ;;  %v585_v9 = vpop.f32.mrb[83].mxu1  ;;  %v893_v10 = vpop.f32.mrb[82].mxu0 }
 0x1e2   :  { %v895_v11 = vpop.f32.mrb[83].mxu0 }
 0x1e3   :  { %v1328_v12 = vpop.eup %1327  ;;  %v894_v13 = vadd.f32 %v893_v10, %v584_v8 }
 0x1e4   :  { %1019 = vst [vmem:[#allocation9 + $0x130] sm:$0xff] %v1328_v12  ;;  %v588_v14 = vpop.f32.mrb[84].mxu1 }
 0x1e5   :  { %1333 = vtanh.f32 %v894_v13  ;;  %v589_v15 = vadd.f32 %v1516_v38, %v588_v14  ;;  %v590_v16 = vpop.f32.mrb[85].mxu1  ;;  %v898_v17 = vpop.f32.mrb[84].mxu0 }
 0x1e6   :  { %v900_v18 = vpop.f32.mrb[85].mxu0 }
 0x1e7   :  { %v1330_v19 = vpop.eup %1329  ;;  %v899_v20 = vadd.f32 %v898_v17, %v589_v15 }
 0x1e8   :  { %1020 = vst [vmem:[#allocation9 + $0x138] sm:$0xff] %v1330_v19  ;;  %v593_v21 = vpop.f32.mrb[86].mxu1 }
 0x1e9   :  { %1335 = vtanh.f32 %v899_v20  ;;  %v594_v22 = vadd.f32 %v1516_v38, %v593_v21  ;;  %v595_v23 = vpop.f32.mrb[87].mxu1  ;;  %v903_v24 = vpop.f32.mrb[86].mxu0 }
 0x1ea   :  { %v905_v25 = vpop.f32.mrb[87].mxu0 }
 0x1eb   :  { %v1332_v26 = vpop.eup %1331  ;;  %v904_v27 = vadd.f32 %v903_v24, %v594_v22 }
 0x1ec   :  { %1021 = vst [vmem:[#allocation9 + $0x140] sm:$0xff] %v1332_v26  ;;  %v598_v28 = vpop.f32.mrb[88].mxu1 }
 0x1ed   :  { %1337 = vtanh.f32 %v904_v27  ;;  %v599_v29 = vadd.f32 %v1516_v38, %v598_v28  ;;  %v600_v30 = vpop.f32.mrb[89].mxu1  ;;  %v908_v31 = vpop.f32.mrb[88].mxu0 }
 0x1ee   :  { %v910_v32 = vpop.f32.mrb[89].mxu0 }
 0x1ef   :  { %v1334_v33 = vpop.eup %1333  ;;  %v909_v34 = vadd.f32 %v908_v31, %v599_v29 }
 0x1f0   :  { %1022 = vst [vmem:[#allocation9 + $0x148] sm:$0xff] %v1334_v33  ;;  %v603_v35 = vpop.f32.mrb[90].mxu1 }
 0x1f1   :  { %1339 = vtanh.f32 %v909_v34  ;;  %v604_v36 = vadd.f32 %v1516_v38, %v603_v35  ;;  %v605_v37 = vpop.f32.mrb[91].mxu1  ;;  %v913_v39 = vpop.f32.mrb[90].mxu0 }
 0x1f2   :  { %v915_v40 = vpop.f32.mrb[91].mxu0 }
 0x1f3   :  { %v1336_v41 = vpop.eup %1335  ;;  %v914_v42 = vadd.f32 %v913_v39, %v604_v36 }
 0x1f4   :  { %1023 = vst [vmem:[#allocation9 + $0x150] sm:$0xff] %v1336_v41  ;;  %v608_v43 = vpop.f32.mrb[92].mxu1 }
 0x1f5   :  { %1341 = vtanh.f32 %v914_v42  ;;  %v609_v44 = vadd.f32 %v1516_v38, %v608_v43  ;;  %v610_v0 = vpop.f32.mrb[93].mxu1  ;;  %v918_v45 = vpop.f32.mrb[92].mxu0 }
 0x1f6   :  { %v920_v46 = vpop.f32.mrb[93].mxu0 }
 0x1f7   :  { %v1338_v47 = vpop.eup %1337  ;;  %v919_v48 = vadd.f32 %v918_v45, %v609_v44 }
 0x1f8   :  { %1024 = vst [vmem:[#allocation9 + $0x158] sm:$0xff] %v1338_v47  ;;  %v613_v49 = vpop.f32.mrb[94].mxu1 }
 0x1f9   :  { %1343 = vtanh.f32 %v919_v48  ;;  %v614_v50 = vadd.f32 %v1516_v38, %v613_v49  ;;  %v615_v51 = vpop.f32.mrb[95].mxu1  ;;  %v923_v52 = vpop.f32.mrb[94].mxu0 }
 0x1fa   :  { %v925_v53 = vpop.f32.mrb[95].mxu0 }
 0x1fb   :  { %v1340_v54 = vpop.eup %1339  ;;  %v924_v55 = vadd.f32 %v923_v52, %v614_v50 }
 0x1fc   :  { %1025 = vst [vmem:[#allocation9 + $0x160] sm:$0xff] %v1340_v54  ;;  %v618_v56 = vpop.f32.mrb[96].mxu1 }
 0x1fd   :  { %1345 = vtanh.f32 %v924_v55  ;;  %v619_v57 = vadd.f32 %v1516_v38, %v618_v56  ;;  %v620_v58 = vpop.f32.mrb[97].mxu1  ;;  %v928_v59 = vpop.f32.mrb[96].mxu0 }
 0x1fe   :  { %v930_v60 = vpop.f32.mrb[97].mxu0 }
 0x1ff   :  { %v1342_v61 = vpop.eup %1341  ;;  %v929_v62 = vadd.f32 %v928_v59, %v619_v57 }
 0x200   :  { %1026 = vst [vmem:[#allocation9 + $0x168] sm:$0xff] %v1342_v61 }
 0x201   :  { %1347 = vtanh.f32 %v929_v62 }
 0x203   :  { %v1344_v63 = vpop.eup %1343 }
 0x204   :  { %1027 = vst [vmem:[#allocation9 + $0x170] sm:$0xff] %v1344_v63 }
 0x207   :  { %v1346_v1 = vpop.eup %1345 }
 0x208   :  { %1028 = vst [vmem:[#allocation9 + $0x178] sm:$0xff] %v1346_v1 }
 0x20b   :  { %v1348_v2 = vpop.eup %1347 }
 0x20c   :  { %1029 = vst [vmem:[#allocation9 + $0x180] sm:$0xff] %v1348_v2 }
 0x20d   :  { %1404 = shalt.err (!%p1401_p6)
}
 0x20e   :  { %s1405_s19 = scalar_lea.hbm %s1586_s4, 6272 }
 0x20f   :  { %p1406_p7 = scmp.ne.s32.totalorder %s1586_s4, %s1405_s19  ;;  %p1409_p8 = scmp.lt.u32.totalorder %s1405_s19, %s1586_s4 }
 0x211   :  { %p1411_p9 = pnand %p1409_p8, %p1406_p7 }
 0x213   :  { %1414 = shalt.err (!%p1411_p9)
}
 0x214   :  { %1041 = dma.vmem_to_hbm [thread:$0]  %s1036_s16, 6272, %s1586_s4, [#allocation6], %s1425_s1, %s1425_s1, %s1426_s12  }
 0x215   :  { %1419 = dma.done.wait [#allocation6], 6272  }
 0x216   :  { %1420 = vsyncadd [#allocation6], 4294961024 }
 0x217   :  { %1045 = vsyncpa [#allocation5], 1 }
 0x218   :  { %1046 = vsyncpa [#allocation8], 1 }
 0x219   :  { %1047 = vsyncpa [#allocation6], 1 }

</bundles_post_ra>
